<compile_context>
chip_gen: v7x
topology: tpu7x:2x2x1
jax: 0.10.0
libtpu: 0.0.40
codegen_flags: <defaults>
</compile_context>

<pallas_src>
import functools
import math

import jax
import jax.numpy as jnp
from jax.experimental import pallas as pl
from jax.experimental.pallas import tpu as pltpu

# ----------------------------------------------------------------------------
# Synthetic hyper-parameters (the original pulls these from missing globals).
# ----------------------------------------------------------------------------
CAT_FEA_HOT = ["c0", "c1", "c2", "c3"]          # cat_dim = 4
VLT_FEA     = ["v0", "v1", "v2", "v3"]          # vlt_dim = 4
SF_FEA      = ["s0", "s1", "s2", "s3"]          # sf_dim  = 4 (unused in forward math)
MORE_FEA    = ["m0", "m1", "m2"]                # oth_dim = 3
IS_FEA      = ["i0", "i1"]                      # is_dim  = 2

rnn_input_dim  = 6
rnn_hidden_len = 32     # LSTM hidden size (4*H = 128 -> lane-aligned gate slab)
rnn_cxt_len    = 8      # context size
num_quantiles  = 3
rnn_pred_long  = 4
rnn_hist_long  = 8

CAT_DIM = len(CAT_FEA_HOT)
VLT_DIM = len(VLT_FEA)
OTH_DIM = len(MORE_FEA)
IS_DIM  = len(IS_FEA)

OUT_W = 128                       # lane-dense packed output width
MATMUL_DTYPE = jnp.bfloat16       # MXU-native on v6e/v7x; f32 accumulation kept

_VMEM = pl.BlockSpec(memory_space=pltpu.MemorySpace.VMEM)  # whole array in VMEM


# ----------------------------------------------------------------------------
# Single fused forward kernel.
# ----------------------------------------------------------------------------
def _fused_kernel(
    # data
    enc_wide_ref, enc_y_ref, dec_wide_ref, x_vc_ref, x_tail_ref,
    # shared encoder (time-tiled block-diag) + LSTM weights
    wencT_ref, bencT_ref, wencP_ref, bencP_ref,
    wihx_ref, wihy_ref, blstm_ref, whh_ref,
    # decoder weights (global split + batched local block weights)
    wg_h_ref, wg_x_ref, bg_ref, aloc_ref, blocw_ref, blocb_ref,
    # vlt branch
    wv1_ref, bv1_ref, wv2_ref, bv2_ref, wv3_ref, bv3_ref,
    # head (fc_3 split by input segment, fc_4, fc_5)
    whx1_ref, whsf_ref, whtl_ref, bh3_ref, wh4_ref, bh4_ref, wh5_ref, bh5_ref,
    # packed output
    o_ref,
    *, T, H):
  f32 = jnp.float32

  def mm(a, w_ref):
    w = w_ref[...]
    return jnp.dot(a.astype(w.dtype), w, preferred_element_type=f32)

  # ---- vlt branch: relu(fc_vlt_1) -> relu(fc_vlt_2) -> fc_vlt_3 -------------
  x_vc = x_vc_ref[...]
  x1 = jnp.maximum(mm(x_vc, wv1_ref) + bv1_ref[...], 0.0)          # (B, 50)
  x1 = jnp.maximum(mm(x1, wv2_ref) + bv2_ref[...], 0.0)            # (B, 20)
  o_vlt = mm(x1, wv3_ref) + bv3_ref[...]                           # (B, vlt)

  # ---- MQ-RNN encoder (history) + hoisted LSTM input projection -------------
  # feat_hist[:, t*cs:(t+1)*cs] == tanh(linear_encoder(enc_X[:, t, :]))
  feat_hist = jnp.tanh(mm(enc_wide_ref[...], wencT_ref) + bencT_ref[...])
  # G[:, t*4H:(t+1)*4H] == x_t @ W_ih^T + b   (x_t = [feat_hist_t, y_t])
  G = mm(feat_hist, wihx_ref) + mm(enc_y_ref[...], wihy_ref) + blstm_ref[...]

  B = x_vc.shape[0]
  G4 = 4 * H
  h = jnp.zeros((B, H), f32)
  c = jnp.zeros((B, H), f32)
  # Statically unrolled T=8 recurrence; only h @ W_hh stays on the serial path.
  for t in range(T):
    g = G[:, t * G4:(t + 1) * G4] + mm(h, whh_ref)                 # (B, 4H)
    sg = jax.nn.sigmoid(g)          # full-width EUP op, then slice per gate
    tg = jnp.tanh(g)
    i_g = sg[:, 0:H]
    f_g = sg[:, H:2 * H]
    g_g = tg[:, 2 * H:3 * H]
    o_g = sg[:, 3 * H:4 * H]
    c = f_g * c + i_g * g_g
    h = o_g * jnp.tanh(c)
  ht = h                                                            # (B, H)

  # ---- decoder: global MLP + batched local MLPs ------------------------------
  # TODO(synk): the reference also runs a bridge_mlp whose output MQ_RNN
  # discards; it is removed here as dead compute (zero functional change).
  feat_pred = jnp.tanh(mm(dec_wide_ref[...], wencP_ref) + bencP_ref[...])  # (B, P*cs)
  cv = jax.nn.sigmoid(mm(ht, wg_h_ref) + mm(feat_pred, wg_x_ref) + bg_ref[...])
  # One matmul produces all P quantile blocks: o_sf[:, k*nq:(k+1)*nq] = q_k
  o_sf = mm(cv, aloc_ref) + mm(feat_pred, blocw_ref) + blocb_ref[...]      # (B, P*nq)

  # ---- head: relu(fc_3) -> relu(fc_4) -> fc_5 (fc_3 via split weights) -------
  hh = jnp.maximum(mm(x1, whx1_ref) + mm(o_sf, whsf_ref)
                   + mm(x_tail_ref[...], whtl_ref) + bh3_ref[...], 0.0)    # (B, 50)
  hh = jnp.maximum(mm(hh, wh4_ref) + bh4_ref[...], 0.0)                    # (B, 100)
  x_head = mm(hh, wh5_ref) + bh5_ref[...]                                  # (B, 1)

  # ---- pack all outputs into one lane-dense slab -----------------------------
  o_ref[...] = jnp.zeros_like(o_ref)
  nv = o_vlt.shape[1]
  ns = o_sf.shape[1]
  o_ref[:, 0:1] = x_head
  o_ref[:, 1:1 + nv] = o_vlt
  o_ref[:, 1 + nv:1 + nv + ns] = o_sf


# ----------------------------------------------------------------------------
# Forward wrapper (all glue here is trivial reshapes/concats of tiny host-side
# tensors; every FLOP runs inside the single pallas_call).
# ----------------------------------------------------------------------------
def end2end_forward(p, enc_X, enc_y, dec_X, x_vlt, x_cat, x_oth, x_is):
  B, T, D = enc_X.shape
  P = dec_X.shape[1]
  H = rnn_hidden_len

  enc_wide = enc_X.reshape(B, T * D).astype(jnp.float32)   # (B, T*D)
  dec_wide = dec_X.reshape(B, P * D).astype(jnp.float32)   # (B, P*D)
  x_vc = jnp.concatenate([x_vlt, x_cat], axis=1).astype(jnp.float32)
  x_tail = jnp.concatenate([x_oth, x_is], axis=1).astype(jnp.float32)

  # TODO(synk): at toy B=2 a single no-grid call is optimal; if batch is ever
  # scaled up, add a batch grid (blocks of >=256 rows, multiples of 8) with
  # dimension_semantics=("parallel",) so v7x's 2 TensorCores both work and
  # tiles stay within its 64 MiB VMEM.
  out = pl.pallas_call(
      functools.partial(_fused_kernel, T=T, H=H),
      out_shape=jax.ShapeDtypeStruct((B, OUT_W), jnp.float32),
      in_specs=[_VMEM] * 33,
      out_specs=_VMEM,
  )(enc_wide, enc_y.astype(jnp.float32), dec_wide, x_vc, x_tail,
    p["wencT"], p["bencT"], p["wencP"], p["bencP"],
    p["wihx"], p["wihy"], p["blstm"], p["whh"],
    p["wg_h"], p["wg_x"], p["bg"], p["aloc"], p["bloc_w"], p["bloc_b"],
    p["wv1"], p["bv1"], p["wv2"], p["bv2"], p["wv3"], p["bv3"],
    p["wh_x1"], p["wh_sf"], p["wh_tail"], p["bh3"],
    p["wh4"], p["bh4"], p["wh5"], p["bh5"])

  nq = num_quantiles
  x = out[:, 0:1]
  o_vlt = out[:, 1:1 + VLT_DIM]
  o_sf = out[:, 1 + VLT_DIM:1 + VLT_DIM + P * nq]
  return x, o_vlt, o_sf


# ----------------------------------------------------------------------------
# Parameter init: kaiming_normal_ (mode='fan_out') like the reference, then
# pre-transposed to (in, out), split / time-tiled into block weights, and the
# matmul operands cast to bf16.  Biases stay f32 (all zero-initialized).
# ----------------------------------------------------------------------------
def _kaiming_t(key, out_dim, in_dim, gain):
  std = gain / math.sqrt(out_dim)   # fan_out of a PyTorch (out, in) Linear
  w = std * jax.random.normal(key, (out_dim, in_dim), jnp.float32)
  return jnp.transpose(w)           # (in, out)


def _block_diag(w, n):
  return jnp.kron(jnp.eye(n, dtype=w.dtype), w)


def init_params(key):
  g_relu, g_tanh, g_lin = math.sqrt(2.0), 5.0 / 3.0, 1.0
  H, cs, P, T = rnn_hidden_len, rnn_cxt_len, rnn_pred_long, rnn_hist_long
  D, nq = rnn_input_dim, num_quantiles
  mdt = MATMUL_DTYPE
  ks = jax.random.split(key, 11)

  def zb(n):
    return jnp.zeros((1, n), jnp.float32)

  p = {}
  # vlt branch
  # TODO(synk): reference declares fc_vlt_1 = Linear(vlt_dim, 50) but feeds
  # cat([x_vlt, x_cat]); in_features fixed to vlt_dim + cat_dim.
  p["wv1"], p["bv1"] = _kaiming_t(ks[0], 50, VLT_DIM + CAT_DIM, g_relu).astype(mdt), zb(50)
  p["wv2"], p["bv2"] = _kaiming_t(ks[1], 20, 50, g_relu).astype(mdt), zb(20)
  p["wv3"], p["bv3"] = _kaiming_t(ks[2], VLT_DIM, 20, g_lin).astype(mdt), zb(VLT_DIM)

  # head (fc_3/fc_4 in_features fixed to the forward dataflow: 37 -> 50 -> 100 -> 1)
  head_in = 20 + P * nq + OTH_DIM + IS_DIM
  wfc3 = _kaiming_t(ks[3], 50, head_in, g_relu)                 # (37, 50)
  p["wh_x1"]   = wfc3[0:20, :].astype(mdt)
  p["wh_sf"]   = wfc3[20:20 + P * nq, :].astype(mdt)
  p["wh_tail"] = wfc3[20 + P * nq:, :].astype(mdt)
  p["bh3"] = zb(50)
  p["wh4"], p["bh4"] = _kaiming_t(ks[4], 100, 50, g_relu).astype(mdt), zb(100)
  p["wh5"], p["bh5"] = _kaiming_t(ks[5], 1, 100, g_lin).astype(mdt), zb(1)

  # MQ-RNN shared linear encoder, expanded to time-tiled block-diag forms so
  # both the hist (T) and pred (P) encodings are single matmuls in the kernel.
  wenc = _kaiming_t(ks[6], cs, D, g_relu)                       # (D, cs)
  benc = zb(cs)
  p["wencT"], p["bencT"] = _block_diag(wenc, T).astype(mdt), jnp.tile(benc, (1, T))
  p["wencP"], p["bencP"] = _block_diag(wenc, P).astype(mdt), jnp.tile(benc, (1, P))

  # LSTM (PyTorch gate order i,f,g,o).  Input projection hoisted: block-diag
  # over time for the feature part, per-step row for the y scalar.
  wih = _kaiming_t(ks[7], 4 * H, cs + 1, g_tanh)                # (cs+1, 4H)
  whh = _kaiming_t(ks[8], 4 * H, H, g_tanh)                     # (H, 4H)
  wih_x, wih_y = wih[0:cs, :], wih[cs:cs + 1, :]
  p["wihx"] = _block_diag(wih_x, T).astype(mdt)                 # (T*cs, T*4H)
  p["wihy"] = jnp.kron(jnp.eye(T, dtype=jnp.float32), wih_y).astype(mdt)  # (T, T*4H)
  p["blstm"] = jnp.tile(zb(4 * H), (1, T))                      # b_ih + b_hh = 0
  p["whh"] = whh.astype(mdt)

  # Decoder global MLP split into (hidden | x_future) operands.
  wg = _kaiming_t(ks[9], cs * (P + 1), H + cs * P, g_relu)      # (H+P*cs, cs*(P+1))
  p["wg_h"], p["wg_x"], p["bg"] = wg[0:H, :].astype(mdt), wg[H:, :].astype(mdt), zb(cs * (P + 1))

  # Decoder local MLP batched across the P horizon steps via block weights:
  #   o_sf = cv @ A + feat_pred @ Bm + b_tiled, with blocks of Wl = [Wc|Wca|Wx].
  wl = _kaiming_t(ks[10], nq, 3 * cs, g_relu)                   # (3*cs, nq); x_dim == cs
  wl_c, wl_ca, wl_x = wl[0:cs, :], wl[cs:2 * cs, :], wl[2 * cs:, :]
  aloc = jnp.zeros((cs * (P + 1), P * nq), jnp.float32)
  for k in range(P):
    aloc = aloc.at[k * cs:(k + 1) * cs, k * nq:(k + 1) * nq].set(wl_c)
    aloc = aloc.at[P * cs:, k * nq:(k + 1) * nq].set(wl_ca)
  p["aloc"] = aloc.astype(mdt)
  p["bloc_w"] = _block_diag(wl_x, P).astype(mdt)                # (P*cs, P*nq)
  p["bloc_b"] = jnp.tile(zb(nq), (1, P))
  # TODO(synk): bridge_mlp (bridge_size from invalid `hidden_dim[2][2]`) is not
  # instantiated — MQ_RNN discards its output.
  return p


# ----------------------------------------------------------------------------
if __name__ == "__main__":
  B = 2
  params = init_params(jax.random.PRNGKey(42))

  key = jax.random.PRNGKey(0)
  k = jax.random.split(key, 7)
  enc_X = jax.random.normal(k[0], (B, rnn_hist_long, rnn_input_dim), jnp.float32)
  enc_y = jax.random.normal(k[1], (B, rnn_hist_long), jnp.float32)
  dec_X = jax.random.normal(k[2], (B, rnn_pred_long, rnn_input_dim), jnp.float32)
  x_vlt = jax.random.normal(k[3], (B, VLT_DIM), jnp.float32)
  x_cat = jax.random.normal(k[4], (B, CAT_DIM), jnp.float32)
  x_oth = jax.random.normal(k[5], (B, OTH_DIM), jnp.float32)
  x_is  = jax.random.normal(k[6], (B, IS_DIM), jnp.float32)

  fwd = jax.jit(functools.partial(end2end_forward, params))
  x, o_vlt, o_sf = fwd(enc_X, enc_y, dec_X, x_vlt, x_cat, x_oth, x_is)
  jax.block_until_ready((x, o_vlt, o_sf))

  assert x.shape == (B, 1)
  assert o_vlt.shape == (B, VLT_DIM)
  assert o_sf.shape == (B, rnn_pred_long * num_quantiles)
  assert all(bool(jnp.all(jnp.isfinite(t))) for t in (x, o_vlt, o_sf))
  print("KERNEL_OK")
</pallas_src>

<mosaic_0001>
module attributes {stable_mosaic.version = 11 : i64} {
  func.func @_fused_kernel(%arg0: memref<2x48xf32, #tpu.memory_space<vmem>>, %arg1: memref<2x8xf32, #tpu.memory_space<vmem>>, %arg2: memref<2x24xf32, #tpu.memory_space<vmem>>, %arg3: memref<2x8xf32, #tpu.memory_space<vmem>>, %arg4: memref<2x5xf32, #tpu.memory_space<vmem>>, %arg5: memref<48x64xbf16, #tpu.memory_space<vmem>>, %arg6: memref<1x64xf32, #tpu.memory_space<vmem>>, %arg7: memref<24x32xbf16, #tpu.memory_space<vmem>>, %arg8: memref<1x32xf32, #tpu.memory_space<vmem>>, %arg9: memref<64x1024xbf16, #tpu.memory_space<vmem>>, %arg10: memref<8x1024xbf16, #tpu.memory_space<vmem>>, %arg11: memref<1x1024xf32, #tpu.memory_space<vmem>>, %arg12: memref<32x128xbf16, #tpu.memory_space<vmem>>, %arg13: memref<32x40xbf16, #tpu.memory_space<vmem>>, %arg14: memref<32x40xbf16, #tpu.memory_space<vmem>>, %arg15: memref<1x40xf32, #tpu.memory_space<vmem>>, %arg16: memref<40x12xbf16, #tpu.memory_space<vmem>>, %arg17: memref<32x12xbf16, #tpu.memory_space<vmem>>, %arg18: memref<1x12xf32, #tpu.memory_space<vmem>>, %arg19: memref<8x50xbf16, #tpu.memory_space<vmem>>, %arg20: memref<1x50xf32, #tpu.memory_space<vmem>>, %arg21: memref<50x20xbf16, #tpu.memory_space<vmem>>, %arg22: memref<1x20xf32, #tpu.memory_space<vmem>>, %arg23: memref<20x4xbf16, #tpu.memory_space<vmem>>, %arg24: memref<1x4xf32, #tpu.memory_space<vmem>>, %arg25: memref<20x50xbf16, #tpu.memory_space<vmem>>, %arg26: memref<12x50xbf16, #tpu.memory_space<vmem>>, %arg27: memref<5x50xbf16, #tpu.memory_space<vmem>>, %arg28: memref<1x50xf32, #tpu.memory_space<vmem>>, %arg29: memref<50x100xbf16, #tpu.memory_space<vmem>>, %arg30: memref<1x100xf32, #tpu.memory_space<vmem>>, %arg31: memref<100x1xbf16, #tpu.memory_space<vmem>>, %arg32: memref<1x1xf32, #tpu.memory_space<vmem>>, %arg33: memref<2x128xf32, #tpu.memory_space<vmem>>) attributes {dimension_semantics = [], scalar_prefetch = 0 : i64, scratch_operands = 0 : i64, tpu.core_type = #tpu.core_type<tc>} {
    %c0 = arith.constant 0 : index
    %c0_0 = arith.constant 0 : index
    %0 = vector.load %arg3[%c0, %c0_0] : memref<2x8xf32, #tpu.memory_space<vmem>>, vector<2x8xf32>
    %c0_1 = arith.constant 0 : index
    %c0_2 = arith.constant 0 : index
    %1 = vector.load %arg19[%c0_1, %c0_2] : memref<8x50xbf16, #tpu.memory_space<vmem>>, vector<8x50xbf16>
    %2 = arith.truncf %0 : vector<2x8xf32> to vector<2x8xbf16>
    %cst = arith.constant dense<0.000000e+00> : vector<2x50xf32>
    %3 = tpu.matmul %2, %1, %cst {dimension_numbers = #tpu.dot_dimension_numbers<[1], [0], [0], [1], [0, 0, 1, 1], [], []>} : vector<2x8xbf16>, vector<8x50xbf16>, vector<2x50xf32> -> vector<2x50xf32>
    %c0_3 = arith.constant 0 : index
    %c0_4 = arith.constant 0 : index
    %4 = vector.load %arg20[%c0_3, %c0_4] : memref<1x50xf32, #tpu.memory_space<vmem>>, vector<1x50xf32>
    %5 = vector.broadcast %4 : vector<1x50xf32> to vector<2x50xf32>
    %6 = arith.addf %3, %5 : vector<2x50xf32>
    %cst_5 = arith.constant 0.000000e+00 : f32
    %7 = vector.broadcast %cst_5 : f32 to vector<2x50xf32>
    %8 = arith.maximumf %6, %7 : vector<2x50xf32>
    %c0_6 = arith.constant 0 : index
    %c0_7 = arith.constant 0 : index
    %9 = vector.load %arg21[%c0_6, %c0_7] : memref<50x20xbf16, #tpu.memory_space<vmem>>, vector<50x20xbf16>
    %10 = arith.truncf %8 : vector<2x50xf32> to vector<2x50xbf16>
    %cst_8 = arith.constant dense<0.000000e+00> : vector<2x20xf32>
    %11 = tpu.matmul %10, %9, %cst_8 {dimension_numbers = #tpu.dot_dimension_numbers<[1], [0], [0], [1], [0, 0, 1, 1], [], []>} : vector<2x50xbf16>, vector<50x20xbf16>, vector<2x20xf32> -> vector<2x20xf32>
    %c0_9 = arith.constant 0 : index
    %c0_10 = arith.constant 0 : index
    %12 = vector.load %arg22[%c0_9, %c0_10] : memref<1x20xf32, #tpu.memory_space<vmem>>, vector<1x20xf32>
    %13 = vector.broadcast %12 : vector<1x20xf32> to vector<2x20xf32>
    %14 = arith.addf %11, %13 : vector<2x20xf32>
    %cst_11 = arith.constant 0.000000e+00 : f32
    %15 = vector.broadcast %cst_11 : f32 to vector<2x20xf32>
    %16 = arith.maximumf %14, %15 : vector<2x20xf32>
    %c0_12 = arith.constant 0 : index
    %c0_13 = arith.constant 0 : index
    %17 = vector.load %arg23[%c0_12, %c0_13] : memref<20x4xbf16, #tpu.memory_space<vmem>>, vector<20x4xbf16>
    %18 = arith.truncf %16 : vector<2x20xf32> to vector<2x20xbf16>
    %cst_14 = arith.constant dense<0.000000e+00> : vector<2x4xf32>
    %19 = tpu.matmul %18, %17, %cst_14 {dimension_numbers = #tpu.dot_dimension_numbers<[1], [0], [0], [1], [0, 0, 1, 1], [], []>} : vector<2x20xbf16>, vector<20x4xbf16>, vector<2x4xf32> -> vector<2x4xf32>
    %c0_15 = arith.constant 0 : index
    %c0_16 = arith.constant 0 : index
    %20 = vector.load %arg24[%c0_15, %c0_16] : memref<1x4xf32, #tpu.memory_space<vmem>>, vector<1x4xf32>
    %21 = vector.broadcast %20 : vector<1x4xf32> to vector<2x4xf32>
    %22 = arith.addf %19, %21 : vector<2x4xf32>
    %c0_17 = arith.constant 0 : index
    %c0_18 = arith.constant 0 : index
    %23 = vector.load %arg0[%c0_17, %c0_18] : memref<2x48xf32, #tpu.memory_space<vmem>>, vector<2x48xf32>
    %c0_19 = arith.constant 0 : index
    %c0_20 = arith.constant 0 : index
    %24 = vector.load %arg5[%c0_19, %c0_20] : memref<48x64xbf16, #tpu.memory_space<vmem>>, vector<48x64xbf16>
    %25 = arith.truncf %23 : vector<2x48xf32> to vector<2x48xbf16>
    %cst_21 = arith.constant dense<0.000000e+00> : vector<2x64xf32>
    %26 = tpu.matmul %25, %24, %cst_21 {dimension_numbers = #tpu.dot_dimension_numbers<[1], [0], [0], [1], [0, 0, 1, 1], [], []>} : vector<2x48xbf16>, vector<48x64xbf16>, vector<2x64xf32> -> vector<2x64xf32>
    %c0_22 = arith.constant 0 : index
    %c0_23 = arith.constant 0 : index
    %27 = vector.load %arg6[%c0_22, %c0_23] : memref<1x64xf32, #tpu.memory_space<vmem>>, vector<1x64xf32>
    %28 = vector.broadcast %27 : vector<1x64xf32> to vector<2x64xf32>
    %29 = arith.addf %26, %28 : vector<2x64xf32>
    %30 = math.tanh %29 : vector<2x64xf32>
    %c0_24 = arith.constant 0 : index
    %c0_25 = arith.constant 0 : index
    %31 = vector.load %arg9[%c0_24, %c0_25] : memref<64x1024xbf16, #tpu.memory_space<vmem>>, vector<64x1024xbf16>
    %32 = arith.truncf %30 : vector<2x64xf32> to vector<2x64xbf16>
    %cst_26 = arith.constant dense<0.000000e+00> : vector<2x1024xf32>
    %33 = tpu.matmul %32, %31, %cst_26 {dimension_numbers = #tpu.dot_dimension_numbers<[1], [0], [0], [1], [0, 0, 1, 1], [], []>} : vector<2x64xbf16>, vector<64x1024xbf16>, vector<2x1024xf32> -> vector<2x1024xf32>
    %c0_27 = arith.constant 0 : index
    %c0_28 = arith.constant 0 : index
    %34 = vector.load %arg1[%c0_27, %c0_28] : memref<2x8xf32, #tpu.memory_space<vmem>>, vector<2x8xf32>
    %c0_29 = arith.constant 0 : index
    %c0_30 = arith.constant 0 : index
    %35 = vector.load %arg10[%c0_29, %c0_30] : memref<8x1024xbf16, #tpu.memory_space<vmem>>, vector<8x1024xbf16>
    %36 = arith.truncf %34 : vector<2x8xf32> to vector<2x8xbf16>
    %cst_31 = arith.constant dense<0.000000e+00> : vector<2x1024xf32>
    %37 = tpu.matmul %36, %35, %cst_31 {dimension_numbers = #tpu.dot_dimension_numbers<[1], [0], [0], [1], [0, 0, 1, 1], [], []>} : vector<2x8xbf16>, vector<8x1024xbf16>, vector<2x1024xf32> -> vector<2x1024xf32>
    %38 = arith.addf %33, %37 : vector<2x1024xf32>
    %c0_32 = arith.constant 0 : index
    %c0_33 = arith.constant 0 : index
    %39 = vector.load %arg11[%c0_32, %c0_33] : memref<1x1024xf32, #tpu.memory_space<vmem>>, vector<1x1024xf32>
    %40 = vector.broadcast %39 : vector<1x1024xf32> to vector<2x1024xf32>
    %41 = arith.addf %38, %40 : vector<2x1024xf32>
    %cst_34 = arith.constant 0.000000e+00 : f32
    %42 = vector.broadcast %cst_34 : f32 to vector<2x32xf32>
    %cst_35 = arith.constant 0.000000e+00 : f32
    %43 = vector.broadcast %cst_35 : f32 to vector<2x32xf32>
    %44 = vector.extract_strided_slice %41 {offsets = [0, 0], sizes = [2, 128], strides = [1, 1]} : vector<2x1024xf32> to vector<2x128xf32>
    %c0_36 = arith.constant 0 : index
    %c0_37 = arith.constant 0 : index
    %45 = vector.load %arg12[%c0_36, %c0_37] : memref<32x128xbf16, #tpu.memory_space<vmem>>, vector<32x128xbf16>
    %46 = arith.truncf %42 : vector<2x32xf32> to vector<2x32xbf16>
    %cst_38 = arith.constant dense<0.000000e+00> : vector<2x128xf32>
    %47 = tpu.matmul %46, %45, %cst_38 {dimension_numbers = #tpu.dot_dimension_numbers<[1], [0], [0], [1], [0, 0, 1, 1], [], []>} : vector<2x32xbf16>, vector<32x128xbf16>, vector<2x128xf32> -> vector<2x128xf32>
    %48 = arith.addf %44, %47 : vector<2x128xf32>
    %49 = arith.negf %48 : vector<2x128xf32>
    %50 = math.exp %49 : vector<2x128xf32>
    %cst_39 = arith.constant 1.000000e+00 : f32
    %51 = vector.broadcast %cst_39 : f32 to vector<2x128xf32>
    %52 = arith.addf %51, %50 : vector<2x128xf32>
    %53 = arith.divf %51, %52 : vector<2x128xf32>
    %54 = math.tanh %48 : vector<2x128xf32>
    %55 = vector.extract_strided_slice %53 {offsets = [0, 0], sizes = [2, 32], strides = [1, 1]} : vector<2x128xf32> to vector<2x32xf32>
    %56 = vector.extract_strided_slice %53 {offsets = [0, 32], sizes = [2, 32], strides = [1, 1]} : vector<2x128xf32> to vector<2x32xf32>
    %57 = vector.extract_strided_slice %54 {offsets = [0, 64], sizes = [2, 32], strides = [1, 1]} : vector<2x128xf32> to vector<2x32xf32>
    %58 = vector.extract_strided_slice %53 {offsets = [0, 96], sizes = [2, 32], strides = [1, 1]} : vector<2x128xf32> to vector<2x32xf32>
    %59 = arith.mulf %56, %43 : vector<2x32xf32>
    %60 = arith.mulf %55, %57 : vector<2x32xf32>
    %61 = arith.addf %59, %60 : vector<2x32xf32>
    %62 = math.tanh %61 : vector<2x32xf32>
    %63 = arith.mulf %58, %62 : vector<2x32xf32>
    %64 = vector.extract_strided_slice %41 {offsets = [0, 128], sizes = [2, 128], strides = [1, 1]} : vector<2x1024xf32> to vector<2x128xf32>
    %c0_40 = arith.constant 0 : index
    %c0_41 = arith.constant 0 : index
    %65 = vector.load %arg12[%c0_40, %c0_41] : memref<32x128xbf16, #tpu.memory_space<vmem>>, vector<32x128xbf16>
    %66 = arith.truncf %63 : vector<2x32xf32> to vector<2x32xbf16>
    %cst_42 = arith.constant dense<0.000000e+00> : vector<2x128xf32>
    %67 = tpu.matmul %66, %65, %cst_42 {dimension_numbers = #tpu.dot_dimension_numbers<[1], [0], [0], [1], [0, 0, 1, 1], [], []>} : vector<2x32xbf16>, vector<32x128xbf16>, vector<2x128xf32> -> vector<2x128xf32>
    %68 = arith.addf %64, %67 : vector<2x128xf32>
    %69 = arith.negf %68 : vector<2x128xf32>
    %70 = math.exp %69 : vector<2x128xf32>
    %cst_43 = arith.constant 1.000000e+00 : f32
    %71 = vector.broadcast %cst_43 : f32 to vector<2x128xf32>
    %72 = arith.addf %71, %70 : vector<2x128xf32>
    %73 = arith.divf %71, %72 : vector<2x128xf32>
    %74 = math.tanh %68 : vector<2x128xf32>
    %75 = vector.extract_strided_slice %73 {offsets = [0, 0], sizes = [2, 32], strides = [1, 1]} : vector<2x128xf32> to vector<2x32xf32>
    %76 = vector.extract_strided_slice %73 {offsets = [0, 32], sizes = [2, 32], strides = [1, 1]} : vector<2x128xf32> to vector<2x32xf32>
    %77 = vector.extract_strided_slice %74 {offsets = [0, 64], sizes = [2, 32], strides = [1, 1]} : vector<2x128xf32> to vector<2x32xf32>
    %78 = vector.extract_strided_slice %73 {offsets = [0, 96], sizes = [2, 32], strides = [1, 1]} : vector<2x128xf32> to vector<2x32xf32>
    %79 = arith.mulf %76, %61 : vector<2x32xf32>
    %80 = arith.mulf %75, %77 : vector<2x32xf32>
    %81 = arith.addf %79, %80 : vector<2x32xf32>
    %82 = math.tanh %81 : vector<2x32xf32>
    %83 = arith.mulf %78, %82 : vector<2x32xf32>
    %84 = vector.extract_strided_slice %41 {offsets = [0, 256], sizes = [2, 128], strides = [1, 1]} : vector<2x1024xf32> to vector<2x128xf32>
    %c0_44 = arith.constant 0 : index
    %c0_45 = arith.constant 0 : index
    %85 = vector.load %arg12[%c0_44, %c0_45] : memref<32x128xbf16, #tpu.memory_space<vmem>>, vector<32x128xbf16>
    %86 = arith.truncf %83 : vector<2x32xf32> to vector<2x32xbf16>
    %cst_46 = arith.constant dense<0.000000e+00> : vector<2x128xf32>
    %87 = tpu.matmul %86, %85, %cst_46 {dimension_numbers = #tpu.dot_dimension_numbers<[1], [0], [0], [1], [0, 0, 1, 1], [], []>} : vector<2x32xbf16>, vector<32x128xbf16>, vector<2x128xf32> -> vector<2x128xf32>
    %88 = arith.addf %84, %87 : vector<2x128xf32>
    %89 = arith.negf %88 : vector<2x128xf32>
    %90 = math.exp %89 : vector<2x128xf32>
    %cst_47 = arith.constant 1.000000e+00 : f32
    %91 = vector.broadcast %cst_47 : f32 to vector<2x128xf32>
    %92 = arith.addf %91, %90 : vector<2x128xf32>
    %93 = arith.divf %91, %92 : vector<2x128xf32>
    %94 = math.tanh %88 : vector<2x128xf32>
    %95 = vector.extract_strided_slice %93 {offsets = [0, 0], sizes = [2, 32], strides = [1, 1]} : vector<2x128xf32> to vector<2x32xf32>
    %96 = vector.extract_strided_slice %93 {offsets = [0, 32], sizes = [2, 32], strides = [1, 1]} : vector<2x128xf32> to vector<2x32xf32>
    %97 = vector.extract_strided_slice %94 {offsets = [0, 64], sizes = [2, 32], strides = [1, 1]} : vector<2x128xf32> to vector<2x32xf32>
    %98 = vector.extract_strided_slice %93 {offsets = [0, 96], sizes = [2, 32], strides = [1, 1]} : vector<2x128xf32> to vector<2x32xf32>
    %99 = arith.mulf %96, %81 : vector<2x32xf32>
    %100 = arith.mulf %95, %97 : vector<2x32xf32>
    %101 = arith.addf %99, %100 : vector<2x32xf32>
    %102 = math.tanh %101 : vector<2x32xf32>
    %103 = arith.mulf %98, %102 : vector<2x32xf32>
    %104 = vector.extract_strided_slice %41 {offsets = [0, 384], sizes = [2, 128], strides = [1, 1]} : vector<2x1024xf32> to vector<2x128xf32>
    %c0_48 = arith.constant 0 : index
    %c0_49 = arith.constant 0 : index
    %105 = vector.load %arg12[%c0_48, %c0_49] : memref<32x128xbf16, #tpu.memory_space<vmem>>, vector<32x128xbf16>
    %106 = arith.truncf %103 : vector<2x32xf32> to vector<2x32xbf16>
    %cst_50 = arith.constant dense<0.000000e+00> : vector<2x128xf32>
    %107 = tpu.matmul %106, %105, %cst_50 {dimension_numbers = #tpu.dot_dimension_numbers<[1], [0], [0], [1], [0, 0, 1, 1], [], []>} : vector<2x32xbf16>, vector<32x128xbf16>, vector<2x128xf32> -> vector<2x128xf32>
    %108 = arith.addf %104, %107 : vector<2x128xf32>
    %109 = arith.negf %108 : vector<2x128xf32>
    %110 = math.exp %109 : vector<2x128xf32>
    %cst_51 = arith.constant 1.000000e+00 : f32
    %111 = vector.broadcast %cst_51 : f32 to vector<2x128xf32>
    %112 = arith.addf %111, %110 : vector<2x128xf32>
    %113 = arith.divf %111, %112 : vector<2x128xf32>
    %114 = math.tanh %108 : vector<2x128xf32>
    %115 = vector.extract_strided_slice %113 {offsets = [0, 0], sizes = [2, 32], strides = [1, 1]} : vector<2x128xf32> to vector<2x32xf32>
    %116 = vector.extract_strided_slice %113 {offsets = [0, 32], sizes = [2, 32], strides = [1, 1]} : vector<2x128xf32> to vector<2x32xf32>
    %117 = vector.extract_strided_slice %114 {offsets = [0, 64], sizes = [2, 32], strides = [1, 1]} : vector<2x128xf32> to vector<2x32xf32>
    %118 = vector.extract_strided_slice %113 {offsets = [0, 96], sizes = [2, 32], strides = [1, 1]} : vector<2x128xf32> to vector<2x32xf32>
    %119 = arith.mulf %116, %101 : vector<2x32xf32>
    %120 = arith.mulf %115, %117 : vector<2x32xf32>
    %121 = arith.addf %119, %120 : vector<2x32xf32>
    %122 = math.tanh %121 : vector<2x32xf32>
    %123 = arith.mulf %118, %122 : vector<2x32xf32>
    %124 = vector.extract_strided_slice %41 {offsets = [0, 512], sizes = [2, 128], strides = [1, 1]} : vector<2x1024xf32> to vector<2x128xf32>
    %c0_52 = arith.constant 0 : index
    %c0_53 = arith.constant 0 : index
    %125 = vector.load %arg12[%c0_52, %c0_53] : memref<32x128xbf16, #tpu.memory_space<vmem>>, vector<32x128xbf16>
    %126 = arith.truncf %123 : vector<2x32xf32> to vector<2x32xbf16>
    %cst_54 = arith.constant dense<0.000000e+00> : vector<2x128xf32>
    %127 = tpu.matmul %126, %125, %cst_54 {dimension_numbers = #tpu.dot_dimension_numbers<[1], [0], [0], [1], [0, 0, 1, 1], [], []>} : vector<2x32xbf16>, vector<32x128xbf16>, vector<2x128xf32> -> vector<2x128xf32>
    %128 = arith.addf %124, %127 : vector<2x128xf32>
    %129 = arith.negf %128 : vector<2x128xf32>
    %130 = math.exp %129 : vector<2x128xf32>
    %cst_55 = arith.constant 1.000000e+00 : f32
    %131 = vector.broadcast %cst_55 : f32 to vector<2x128xf32>
    %132 = arith.addf %131, %130 : vector<2x128xf32>
    %133 = arith.divf %131, %132 : vector<2x128xf32>
    %134 = math.tanh %128 : vector<2x128xf32>
    %135 = vector.extract_strided_slice %133 {offsets = [0, 0], sizes = [2, 32], strides = [1, 1]} : vector<2x128xf32> to vector<2x32xf32>
    %136 = vector.extract_strided_slice %133 {offsets = [0, 32], sizes = [2, 32], strides = [1, 1]} : vector<2x128xf32> to vector<2x32xf32>
    %137 = vector.extract_strided_slice %134 {offsets = [0, 64], sizes = [2, 32], strides = [1, 1]} : vector<2x128xf32> to vector<2x32xf32>
    %138 = vector.extract_strided_slice %133 {offsets = [0, 96], sizes = [2, 32], strides = [1, 1]} : vector<2x128xf32> to vector<2x32xf32>
    %139 = arith.mulf %136, %121 : vector<2x32xf32>
    %140 = arith.mulf %135, %137 : vector<2x32xf32>
    %141 = arith.addf %139, %140 : vector<2x32xf32>
    %142 = math.tanh %141 : vector<2x32xf32>
    %143 = arith.mulf %138, %142 : vector<2x32xf32>
    %144 = vector.extract_strided_slice %41 {offsets = [0, 640], sizes = [2, 128], strides = [1, 1]} : vector<2x1024xf32> to vector<2x128xf32>
    %c0_56 = arith.constant 0 : index
    %c0_57 = arith.constant 0 : index
    %145 = vector.load %arg12[%c0_56, %c0_57] : memref<32x128xbf16, #tpu.memory_space<vmem>>, vector<32x128xbf16>
    %146 = arith.truncf %143 : vector<2x32xf32> to vector<2x32xbf16>
    %cst_58 = arith.constant dense<0.000000e+00> : vector<2x128xf32>
    %147 = tpu.matmul %146, %145, %cst_58 {dimension_numbers = #tpu.dot_dimension_numbers<[1], [0], [0], [1], [0, 0, 1, 1], [], []>} : vector<2x32xbf16>, vector<32x128xbf16>, vector<2x128xf32> -> vector<2x128xf32>
    %148 = arith.addf %144, %147 : vector<2x128xf32>
    %149 = arith.negf %148 : vector<2x128xf32>
    %150 = math.exp %149 : vector<2x128xf32>
    %cst_59 = arith.constant 1.000000e+00 : f32
    %151 = vector.broadcast %cst_59 : f32 to vector<2x128xf32>
    %152 = arith.addf %151, %150 : vector<2x128xf32>
    %153 = arith.divf %151, %152 : vector<2x128xf32>
    %154 = math.tanh %148 : vector<2x128xf32>
    %155 = vector.extract_strided_slice %153 {offsets = [0, 0], sizes = [2, 32], strides = [1, 1]} : vector<2x128xf32> to vector<2x32xf32>
    %156 = vector.extract_strided_slice %153 {offsets = [0, 32], sizes = [2, 32], strides = [1, 1]} : vector<2x128xf32> to vector<2x32xf32>
    %157 = vector.extract_strided_slice %154 {offsets = [0, 64], sizes = [2, 32], strides = [1, 1]} : vector<2x128xf32> to vector<2x32xf32>
    %158 = vector.extract_strided_slice %153 {offsets = [0, 96], sizes = [2, 32], strides = [1, 1]} : vector<2x128xf32> to vector<2x32xf32>
    %159 = arith.mulf %156, %141 : vector<2x32xf32>
    %160 = arith.mulf %155, %157 : vector<2x32xf32>
    %161 = arith.addf %159, %160 : vector<2x32xf32>
    %162 = math.tanh %161 : vector<2x32xf32>
    %163 = arith.mulf %158, %162 : vector<2x32xf32>
    %164 = vector.extract_strided_slice %41 {offsets = [0, 768], sizes = [2, 128], strides = [1, 1]} : vector<2x1024xf32> to vector<2x128xf32>
    %c0_60 = arith.constant 0 : index
    %c0_61 = arith.constant 0 : index
    %165 = vector.load %arg12[%c0_60, %c0_61] : memref<32x128xbf16, #tpu.memory_space<vmem>>, vector<32x128xbf16>
    %166 = arith.truncf %163 : vector<2x32xf32> to vector<2x32xbf16>
    %cst_62 = arith.constant dense<0.000000e+00> : vector<2x128xf32>
    %167 = tpu.matmul %166, %165, %cst_62 {dimension_numbers = #tpu.dot_dimension_numbers<[1], [0], [0], [1], [0, 0, 1, 1], [], []>} : vector<2x32xbf16>, vector<32x128xbf16>, vector<2x128xf32> -> vector<2x128xf32>
    %168 = arith.addf %164, %167 : vector<2x128xf32>
    %169 = arith.negf %168 : vector<2x128xf32>
    %170 = math.exp %169 : vector<2x128xf32>
    %cst_63 = arith.constant 1.000000e+00 : f32
    %171 = vector.broadcast %cst_63 : f32 to vector<2x128xf32>
    %172 = arith.addf %171, %170 : vector<2x128xf32>
    %173 = arith.divf %171, %172 : vector<2x128xf32>
    %174 = math.tanh %168 : vector<2x128xf32>
    %175 = vector.extract_strided_slice %173 {offsets = [0, 0], sizes = [2, 32], strides = [1, 1]} : vector<2x128xf32> to vector<2x32xf32>
    %176 = vector.extract_strided_slice %173 {offsets = [0, 32], sizes = [2, 32], strides = [1, 1]} : vector<2x128xf32> to vector<2x32xf32>
    %177 = vector.extract_strided_slice %174 {offsets = [0, 64], sizes = [2, 32], strides = [1, 1]} : vector<2x128xf32> to vector<2x32xf32>
    %178 = vector.extract_strided_slice %173 {offsets = [0, 96], sizes = [2, 32], strides = [1, 1]} : vector<2x128xf32> to vector<2x32xf32>
    %179 = arith.mulf %176, %161 : vector<2x32xf32>
    %180 = arith.mulf %175, %177 : vector<2x32xf32>
    %181 = arith.addf %179, %180 : vector<2x32xf32>
    %182 = math.tanh %181 : vector<2x32xf32>
    %183 = arith.mulf %178, %182 : vector<2x32xf32>
    %184 = vector.extract_strided_slice %41 {offsets = [0, 896], sizes = [2, 128], strides = [1, 1]} : vector<2x1024xf32> to vector<2x128xf32>
    %c0_64 = arith.constant 0 : index
    %c0_65 = arith.constant 0 : index
    %185 = vector.load %arg12[%c0_64, %c0_65] : memref<32x128xbf16, #tpu.memory_space<vmem>>, vector<32x128xbf16>
    %186 = arith.truncf %183 : vector<2x32xf32> to vector<2x32xbf16>
    %cst_66 = arith.constant dense<0.000000e+00> : vector<2x128xf32>
    %187 = tpu.matmul %186, %185, %cst_66 {dimension_numbers = #tpu.dot_dimension_numbers<[1], [0], [0], [1], [0, 0, 1, 1], [], []>} : vector<2x32xbf16>, vector<32x128xbf16>, vector<2x128xf32> -> vector<2x128xf32>
    %188 = arith.addf %184, %187 : vector<2x128xf32>
    %189 = arith.negf %188 : vector<2x128xf32>
    %190 = math.exp %189 : vector<2x128xf32>
    %cst_67 = arith.constant 1.000000e+00 : f32
    %191 = vector.broadcast %cst_67 : f32 to vector<2x128xf32>
    %192 = arith.addf %191, %190 : vector<2x128xf32>
    %193 = arith.divf %191, %192 : vector<2x128xf32>
    %194 = math.tanh %188 : vector<2x128xf32>
    %195 = vector.extract_strided_slice %193 {offsets = [0, 0], sizes = [2, 32], strides = [1, 1]} : vector<2x128xf32> to vector<2x32xf32>
    %196 = vector.extract_strided_slice %193 {offsets = [0, 32], sizes = [2, 32], strides = [1, 1]} : vector<2x128xf32> to vector<2x32xf32>
    %197 = vector.extract_strided_slice %194 {offsets = [0, 64], sizes = [2, 32], strides = [1, 1]} : vector<2x128xf32> to vector<2x32xf32>
    %198 = vector.extract_strided_slice %193 {offsets = [0, 96], sizes = [2, 32], strides = [1, 1]} : vector<2x128xf32> to vector<2x32xf32>
    %199 = arith.mulf %196, %181 : vector<2x32xf32>
    %200 = arith.mulf %195, %197 : vector<2x32xf32>
    %201 = arith.addf %199, %200 : vector<2x32xf32>
    %202 = math.tanh %201 : vector<2x32xf32>
    %203 = arith.mulf %198, %202 : vector<2x32xf32>
    %c0_68 = arith.constant 0 : index
    %c0_69 = arith.constant 0 : index
    %204 = vector.load %arg2[%c0_68, %c0_69] : memref<2x24xf32, #tpu.memory_space<vmem>>, vector<2x24xf32>
    %c0_70 = arith.constant 0 : index
    %c0_71 = arith.constant 0 : index
    %205 = vector.load %arg7[%c0_70, %c0_71] : memref<24x32xbf16, #tpu.memory_space<vmem>>, vector<24x32xbf16>
    %206 = arith.truncf %204 : vector<2x24xf32> to vector<2x24xbf16>
    %cst_72 = arith.constant dense<0.000000e+00> : vector<2x32xf32>
    %207 = tpu.matmul %206, %205, %cst_72 {dimension_numbers = #tpu.dot_dimension_numbers<[1], [0], [0], [1], [0, 0, 1, 1], [], []>} : vector<2x24xbf16>, vector<24x32xbf16>, vector<2x32xf32> -> vector<2x32xf32>
    %c0_73 = arith.constant 0 : index
    %c0_74 = arith.constant 0 : index
    %208 = vector.load %arg8[%c0_73, %c0_74] : memref<1x32xf32, #tpu.memory_space<vmem>>, vector<1x32xf32>
    %209 = vector.broadcast %208 : vector<1x32xf32> to vector<2x32xf32>
    %210 = arith.addf %207, %209 : vector<2x32xf32>
    %211 = math.tanh %210 : vector<2x32xf32>
    %c0_75 = arith.constant 0 : index
    %c0_76 = arith.constant 0 : index
    %212 = vector.load %arg13[%c0_75, %c0_76] : memref<32x40xbf16, #tpu.memory_space<vmem>>, vector<32x40xbf16>
    %213 = arith.truncf %203 : vector<2x32xf32> to vector<2x32xbf16>
    %cst_77 = arith.constant dense<0.000000e+00> : vector<2x40xf32>
    %214 = tpu.matmul %213, %212, %cst_77 {dimension_numbers = #tpu.dot_dimension_numbers<[1], [0], [0], [1], [0, 0, 1, 1], [], []>} : vector<2x32xbf16>, vector<32x40xbf16>, vector<2x40xf32> -> vector<2x40xf32>
    %c0_78 = arith.constant 0 : index
    %c0_79 = arith.constant 0 : index
    %215 = vector.load %arg14[%c0_78, %c0_79] : memref<32x40xbf16, #tpu.memory_space<vmem>>, vector<32x40xbf16>
    %216 = arith.truncf %211 : vector<2x32xf32> to vector<2x32xbf16>
    %cst_80 = arith.constant dense<0.000000e+00> : vector<2x40xf32>
    %217 = tpu.matmul %216, %215, %cst_80 {dimension_numbers = #tpu.dot_dimension_numbers<[1], [0], [0], [1], [0, 0, 1, 1], [], []>} : vector<2x32xbf16>, vector<32x40xbf16>, vector<2x40xf32> -> vector<2x40xf32>
    %218 = arith.addf %214, %217 : vector<2x40xf32>
    %c0_81 = arith.constant 0 : index
    %c0_82 = arith.constant 0 : index
    %219 = vector.load %arg15[%c0_81, %c0_82] : memref<1x40xf32, #tpu.memory_space<vmem>>, vector<1x40xf32>
    %220 = vector.broadcast %219 : vector<1x40xf32> to vector<2x40xf32>
    %221 = arith.addf %218, %220 : vector<2x40xf32>
    %222 = arith.negf %221 : vector<2x40xf32>
    %223 = math.exp %222 : vector<2x40xf32>
    %cst_83 = arith.constant 1.000000e+00 : f32
    %224 = vector.broadcast %cst_83 : f32 to vector<2x40xf32>
    %225 = arith.addf %224, %223 : vector<2x40xf32>
    %226 = arith.divf %224, %225 : vector<2x40xf32>
    %c0_84 = arith.constant 0 : index
    %c0_85 = arith.constant 0 : index
    %227 = vector.load %arg16[%c0_84, %c0_85] : memref<40x12xbf16, #tpu.memory_space<vmem>>, vector<40x12xbf16>
    %228 = arith.truncf %226 : vector<2x40xf32> to vector<2x40xbf16>
    %cst_86 = arith.constant dense<0.000000e+00> : vector<2x12xf32>
    %229 = tpu.matmul %228, %227, %cst_86 {dimension_numbers = #tpu.dot_dimension_numbers<[1], [0], [0], [1], [0, 0, 1, 1], [], []>} : vector<2x40xbf16>, vector<40x12xbf16>, vector<2x12xf32> -> vector<2x12xf32>
    %c0_87 = arith.constant 0 : index
    %c0_88 = arith.constant 0 : index
    %230 = vector.load %arg17[%c0_87, %c0_88] : memref<32x12xbf16, #tpu.memory_space<vmem>>, vector<32x12xbf16>
    %231 = arith.truncf %211 : vector<2x32xf32> to vector<2x32xbf16>
    %cst_89 = arith.constant dense<0.000000e+00> : vector<2x12xf32>
    %232 = tpu.matmul %231, %230, %cst_89 {dimension_numbers = #tpu.dot_dimension_numbers<[1], [0], [0], [1], [0, 0, 1, 1], [], []>} : vector<2x32xbf16>, vector<32x12xbf16>, vector<2x12xf32> -> vector<2x12xf32>
    %233 = arith.addf %229, %232 : vector<2x12xf32>
    %c0_90 = arith.constant 0 : index
    %c0_91 = arith.constant 0 : index
    %234 = vector.load %arg18[%c0_90, %c0_91] : memref<1x12xf32, #tpu.memory_space<vmem>>, vector<1x12xf32>
    %235 = vector.broadcast %234 : vector<1x12xf32> to vector<2x12xf32>
    %236 = arith.addf %233, %235 : vector<2x12xf32>
    %c0_92 = arith.constant 0 : index
    %c0_93 = arith.constant 0 : index
    %237 = vector.load %arg25[%c0_92, %c0_93] : memref<20x50xbf16, #tpu.memory_space<vmem>>, vector<20x50xbf16>
    %238 = arith.truncf %16 : vector<2x20xf32> to vector<2x20xbf16>
    %cst_94 = arith.constant dense<0.000000e+00> : vector<2x50xf32>
    %239 = tpu.matmul %238, %237, %cst_94 {dimension_numbers = #tpu.dot_dimension_numbers<[1], [0], [0], [1], [0, 0, 1, 1], [], []>} : vector<2x20xbf16>, vector<20x50xbf16>, vector<2x50xf32> -> vector<2x50xf32>
    %c0_95 = arith.constant 0 : index
    %c0_96 = arith.constant 0 : index
    %240 = vector.load %arg26[%c0_95, %c0_96] : memref<12x50xbf16, #tpu.memory_space<vmem>>, vector<12x50xbf16>
    %241 = arith.truncf %236 : vector<2x12xf32> to vector<2x12xbf16>
    %cst_97 = arith.constant dense<0.000000e+00> : vector<2x50xf32>
    %242 = tpu.matmul %241, %240, %cst_97 {dimension_numbers = #tpu.dot_dimension_numbers<[1], [0], [0], [1], [0, 0, 1, 1], [], []>} : vector<2x12xbf16>, vector<12x50xbf16>, vector<2x50xf32> -> vector<2x50xf32>
    %243 = arith.addf %239, %242 : vector<2x50xf32>
    %c0_98 = arith.constant 0 : index
    %c0_99 = arith.constant 0 : index
    %244 = vector.load %arg4[%c0_98, %c0_99] : memref<2x5xf32, #tpu.memory_space<vmem>>, vector<2x5xf32>
    %c0_100 = arith.constant 0 : index
    %c0_101 = arith.constant 0 : index
    %245 = vector.load %arg27[%c0_100, %c0_101] : memref<5x50xbf16, #tpu.memory_space<vmem>>, vector<5x50xbf16>
    %246 = arith.truncf %244 : vector<2x5xf32> to vector<2x5xbf16>
    %cst_102 = arith.constant dense<0.000000e+00> : vector<2x50xf32>
    %247 = tpu.matmul %246, %245, %cst_102 {dimension_numbers = #tpu.dot_dimension_numbers<[1], [0], [0], [1], [0, 0, 1, 1], [], []>} : vector<2x5xbf16>, vector<5x50xbf16>, vector<2x50xf32> -> vector<2x50xf32>
    %248 = arith.addf %243, %247 : vector<2x50xf32>
    %c0_103 = arith.constant 0 : index
    %c0_104 = arith.constant 0 : index
    %249 = vector.load %arg28[%c0_103, %c0_104] : memref<1x50xf32, #tpu.memory_space<vmem>>, vector<1x50xf32>
    %250 = vector.broadcast %249 : vector<1x50xf32> to vector<2x50xf32>
    %251 = arith.addf %248, %250 : vector<2x50xf32>
    %cst_105 = arith.constant 0.000000e+00 : f32
    %252 = vector.broadcast %cst_105 : f32 to vector<2x50xf32>
    %253 = arith.maximumf %251, %252 : vector<2x50xf32>
    %c0_106 = arith.constant 0 : index
    %c0_107 = arith.constant 0 : index
    %254 = vector.load %arg29[%c0_106, %c0_107] : memref<50x100xbf16, #tpu.memory_space<vmem>>, vector<50x100xbf16>
    %255 = arith.truncf %253 : vector<2x50xf32> to vector<2x50xbf16>
    %cst_108 = arith.constant dense<0.000000e+00> : vector<2x100xf32>
    %256 = tpu.matmul %255, %254, %cst_108 {dimension_numbers = #tpu.dot_dimension_numbers<[1], [0], [0], [1], [0, 0, 1, 1], [], []>} : vector<2x50xbf16>, vector<50x100xbf16>, vector<2x100xf32> -> vector<2x100xf32>
    %c0_109 = arith.constant 0 : index
    %c0_110 = arith.constant 0 : index
    %257 = vector.load %arg30[%c0_109, %c0_110] : memref<1x100xf32, #tpu.memory_space<vmem>>, vector<1x100xf32>
    %258 = vector.broadcast %257 : vector<1x100xf32> to vector<2x100xf32>
    %259 = arith.addf %256, %258 : vector<2x100xf32>
    %cst_111 = arith.constant 0.000000e+00 : f32
    %260 = vector.broadcast %cst_111 : f32 to vector<2x100xf32>
    %261 = arith.maximumf %259, %260 : vector<2x100xf32>
    %c0_112 = arith.constant 0 : index
    %c0_113 = arith.constant 0 : index
    %262 = vector.load %arg31[%c0_112, %c0_113] : memref<100x1xbf16, #tpu.memory_space<vmem>>, vector<100x1xbf16>
    %263 = arith.truncf %261 : vector<2x100xf32> to vector<2x100xbf16>
    %cst_114 = arith.constant dense<0.000000e+00> : vector<2x1xf32>
    %264 = tpu.matmul %263, %262, %cst_114 {dimension_numbers = #tpu.dot_dimension_numbers<[1], [0], [0], [1], [0, 0, 1, 1], [], []>} : vector<2x100xbf16>, vector<100x1xbf16>, vector<2x1xf32> -> vector<2x1xf32>
    %c0_115 = arith.constant 0 : index
    %c0_116 = arith.constant 0 : index
    %265 = vector.load %arg32[%c0_115, %c0_116] : memref<1x1xf32, #tpu.memory_space<vmem>>, vector<1x1xf32>
    %266 = vector.broadcast %265 : vector<1x1xf32> to vector<2x1xf32>
    %267 = arith.addf %264, %266 : vector<2x1xf32>
    %cst_117 = arith.constant 0.000000e+00 : f32
    %268 = vector.broadcast %cst_117 : f32 to vector<2x128xf32>
    %c0_118 = arith.constant 0 : index
    %c0_119 = arith.constant 0 : index
    %269 = vector.load %arg33[%c0_118, %c0_119] : memref<2x128xf32, #tpu.memory_space<vmem>>, vector<2x128xf32>
    tpu.vector_store %arg33[%c0_118, %c0_119], %268 {strides = array<i32>} : memref<2x128xf32, #tpu.memory_space<vmem>>, vector<2x128xf32>,
    %c0_120 = arith.constant 0 : index
    %c0_121 = arith.constant 0 : index
    %270 = vector.load %arg33[%c0_120, %c0_121] : memref<2x128xf32, #tpu.memory_space<vmem>>, vector<2x1xf32>
    tpu.vector_store %arg33[%c0_120, %c0_121], %267 {strides = array<i32>} : memref<2x128xf32, #tpu.memory_space<vmem>>, vector<2x1xf32>,
    %c0_122 = arith.constant 0 : index
    %c1 = arith.constant 1 : index
    %271 = vector.load %arg33[%c0_122, %c1] : memref<2x128xf32, #tpu.memory_space<vmem>>, vector<2x4xf32>
    tpu.vector_store %arg33[%c0_122, %c1], %22 {strides = array<i32>} : memref<2x128xf32, #tpu.memory_space<vmem>>, vector<2x4xf32>,
    %c0_123 = arith.constant 0 : index
    %c5 = arith.constant 5 : index
    %272 = vector.load %arg33[%c0_123, %c5] : memref<2x128xf32, #tpu.memory_space<vmem>>, vector<2x12xf32>
    tpu.vector_store %arg33[%c0_123, %c5], %236 {strides = array<i32>} : memref<2x128xf32, #tpu.memory_space<vmem>>, vector<2x12xf32>,
    return
  }
}

</mosaic_0001>

<bundles_post_ra>
// kernel: end2end_forward.1
= control target key start
LH: loop header
LB: loop body
LE: loop exit
PB: predicated region body
PF: predicated region fallthrough
CT: control target
= control target key end

     0   :  { %v2950_v0 = vmov 0.0   ;;  %s2951_s3 = smov 19   ;;  %vm2952_vm0 = vmmov 0   ;;  %s2953_s7 = smov 3   ;;  %vm155_vm1 = vcmask 1043456   ;;  %vm151_vm2 = vcmask 64512   ;;  %s3397_s0 = inlined_call_operand.smem [shape: u32[34], index: -1, kind: input, shape index: {}] }
   0x1   :  { %2604 = vmatprep.subr.bf16.mxu0 %v2950_v0  ;;  %s2387_s6 = sld [smem:[%s3397_s0 + %s2951_s3]]   ;;  %2606 = vmatprep.mubr.msk.bf16.mxu0 %vm2952_vm0, %v2950_v0  ;;  %s2954_s11 = smov 21   ;;  %vm240_vm3 = vcmask 1040384   ;;  %vm386_vm4 = vcmask 392192   ;;  %v2958_v15 = vmov 0   ;;  %vm236_vm5 = vcmask 408576  }
   0x2   :  { %s2371_s10 = sld [smem:[%s3397_s0 + %s2953_s7]]   ;;  %2610 = vmatprep.subr.bf16.mxu1 %v2950_v0  ;;  %2618 = vmatprep.mubr.msk.bf16.mxu1 %vm2952_vm0, %v2950_v0  ;;  %s2955_s15 = smov 5   ;;  %vm309_vm6 = vcmask 1041408   ;;  %vm841_vm7 = vcmask 523264   ;;  %vm305_vm8 = vcmask 162816   ;;  %vm1075_vm9 = vcmask 261120  }
   0x3   :  { %s2389_s14 = sld [smem:[%s3397_s0 + %s2954_s11]]   ;;  %s2956_s22 = smov 10   ;;  %vm1669_vm10 = vcmask 195584   ;;  %vm1931_vm11 = vcmask 326656   ;;  %vm2001_vm12 = vcmask 1045504   ;;  %vm2104_vm13 = vcmask 1042432  }
   0x4   :  { %s2373_s18 = sld [smem:[%s3397_s0 + %s2955_s15]]   ;;  %s2957_s26 = smov 1   ;;  %vm1997_vm14 = vcmask 97280   ;;  %vm2100_vm15 = vcmask 39936  }
   0x5   :  { %s1_s21 = sld [smem:[%s3397_s0]]   ;;  %s2959_s30 = smov 20  }
   0x6   :  { %s3030_s25 = sld [smem:[%s3397_s0 + %s2956_s22]]   ;;  %s2960_s4 = smov 23  }
   0x7   :  { %v142_v1 = vld [vmem:[%s2387_s6] sm:$0xf]  ;;  %s2369_s29 = sld [smem:[%s3397_s0 + %s2957_s26]]   ;;  %s2961_s8 = smov 9  }
   0x8   :  { %v141_v2 = vld [vmem:[%s2371_s10] sm:$0x3]  ;;  %v157_v3 = vsel %vm155_vm1, %v142_v1, 0  ;;  %s2388_s3 = sld [smem:[%s3397_s0 + %s2959_s30]]   ;;  %s2962_s12 = smov 6  }
   0x9   :  { %v143_v4 = vpack.c.bf16 %v141_v2, %v141_v2  ;;  %2605 = vmatpush3.bf16.msra.mxu0 %v157_v3  ;;  %v2834_v5 = vld [vmem:[%s2389_s14] sm:$0xff]   ;;  %v2835_v6 = vld [vmem:[%s2389_s14 + $0x8] sm:$0xff]   ;;  %v2836_v7 = vld [vmem:[%s2389_s14 + $0x10] sm:$0xff]   ;;  %s2391_s7 = sld [smem:[%s3397_s0 + %s2960_s4]]   ;;  %s2963_s17 = smov 12  }
   0xa   :  { %2630 = vmatprep.subr.bf16.mxu0 %v2950_v0  ;;  %2611 = vmatpush3.bf16.msra.mxu1 %v2834_v5  ;;  %v2837_v8 = vld [vmem:[%s2373_s18] sm:$0xff]   ;;  %v2838_v9 = vld [vmem:[%s2389_s14 + $0x18] ss:$0 sps:$4 sm:$0x11]   ;;  %v2839_v11 = vld [vmem:[%s2373_s18 + $0x8] sm:$0xff]   ;;  %s3057_s11 = sld [smem:[%s3397_s0 + %s2961_s8]]   ;;  %s2966_s30 = smov 64  }
   0xb   :  { %2612 = vmatprep.subr.bf16.mxu1 %v2950_v0  ;;  %v242_v10 = vsel %vm240_vm3, %v2838_v9, 0  ;;  %v2840_v12 = vld [vmem:[%s2373_s18 + $0x10] sm:$0xff]   ;;  %v353_v13 = vld [vmem:[%s1_s21] sm:$0x3]  ;;  %s2374_s16 = sld [smem:[%s3397_s0 + %s2962_s12]]   ;;  %s2964_s21 = smov 22  }
   0xc   :  { %2607 = vmatmul.mubr.msk.bf16.vlgmr.msra.gmra.mrb[0].mxu0 %vm151_vm2, %v143_v4  ;;  %v360_v14 = vpack.c.bf16 %v353_v13, %v353_v13  ;;  %v466_v16 = vld [vmem:[%s3030_s25 + $0x8] sm:$0xff]  ;;  %v468_v30 = vld [vmem:[%s3030_s25 + $0x18] sm:$0xff]  ;;  %v3075_v48 = vld [vmem:[%s3030_s25] sm:$0xff]  ;;  %s2380_s20 = sld [smem:[%s3397_s0 + %s2963_s17]]   ;;  %s2967_s1 = smov 32  }
   0xd   :  { %2636 = vmatprep.mubr.msk.bf16.mxu0 %vm2952_vm0, %v2950_v0  ;;  %2631 = vmatpush3.bf16.msra.mxu0 %v2837_v8  ;;  %v464_v17 = vld [vmem:[%s2369_s29] sm:$0x3]  ;;  %v2422_v18 = vcombine.high %v466_v16, %v466_v16  ;;  %v2421_v19 = vcombine.low %v466_v16, %v466_v16  ;;  %v2426_v32 = vcombine.high %v468_v30, %v468_v30  ;;  %s2390_s24 = sld [smem:[%s3397_s0 + %s2964_s21]]   ;;  %s2968_s2 = smov 7  }
   0xe   :  { %2613 = vmatpush3.bf16.msra.mxu1 %v2835_v6  ;;  %2632 = vmatprep.subr.bf16.mxu0 %v2950_v0  ;;  %v3040_v21 = vpack.c.bf16 %v464_v17, %v464_v17  ;;  %v2402_v22 = vld [vmem:[%s2388_s3] ss:$0 sm:$0xff]  ;;  %v2425_v33 = vcombine.low %v468_v30, %v468_v30  ;;  %v2420_v51 = vcombine.high %v3075_v48, %v3075_v48  ;;  %s2375_s5 = sld [smem:[%s3397_s0 + %s2968_s2]]   ;;  %s2969_s6 = smov 2  }
   0xf   :  { %2614 = vmatprep.subr.bf16.mxu1 %v2950_v0  ;;  %v500_v20 = vsel %vm155_vm1, %v2421_v19, 0  ;;  %v2843_v31 = vld [vmem:[%s2391_s7] sm:$0xff]   ;;  %v2846_v35 = vld [vmem:[%s2391_s7 + $0x8] ss:$0 sps:$4 sm:$0x33]   ;;  %s2370_s9 = sld [smem:[%s3397_s0 + %s2969_s6]]   ;;  %s2970_s10 = smov 24  }
  0x10   :  { %v512_v34 = vsel %vm155_vm1, %v2425_v33, 0  ;;  %v432_v36 = vld [vmem:[%s3057_s11 + $0x8] sm:$0xff]  ;;  %v311_v39 = vsel %vm309_vm6, %v2846_v35, 0  ;;  %v434_v61 = vld [vmem:[%s3057_s11 + $0x18] sm:$0xff]  ;;  %v431_v33 = vld [vmem:[%s3057_s11] sm:$0xff]  ;;  %s2392_s13 = sld [smem:[%s3397_s0 + %s2970_s10]]   ;;  %s2971_s14 = smov 14  }
  0x11   :  { %2633 = vmatpush3.bf16.msra.mxu0 %v2839_v11  ;;  %v436_v37 = vld [vmem:[%s3057_s11 + $0x28] sm:$0xff]  ;;  %v2414_v41 = vld [vmem:[%s2374_s16] ss:$0 sm:$0xff]  ;;  %v438_v62 = vld [vmem:[%s3057_s11 + $0x38] sm:$0xff]  ;;  %s2382_s18 = sld [smem:[%s3397_s0 + %s2971_s14]]   ;;  %s2972_s19 = smov 17  }
  0x12   :  { %2615 = vmatpush3.bf16.msra.mxu1 %v2836_v7  ;;  %2634 = vmatprep.subr.bf16.mxu0 %v2950_v0  ;;  %v2438_v38 = vcombine.high %v432_v36, %v436_v37  ;;  %v2437_v40 = vcombine.low %v432_v36, %v436_v37  ;;  %v440_v43 = vld [vmem:[%s3057_s11 + $0x48] sm:$0xff]  ;;  %v2442_v63 = vcombine.high %v434_v61, %v438_v62  ;;  %v442_v4 = vld [vmem:[%s3057_s11 + $0x58] sm:$0xff]  ;;  %v3105_v17 = vld [vmem:[%s2380_s20] sm:$0xff]   ;;  %s3282_s22 = sld [smem:[%s3397_s0 + %s2972_s19]]   ;;  %s2973_s23 = smov 13  }
  0x13   :  { %2616 = vmatprep.subr.bf16.mxu1 %v2950_v0  ;;  %v444_v44 = vld [vmem:[%s3057_s11 + $0x68] sm:$0xff]  ;;  %v2441_v2 = vcombine.low %v434_v61, %v438_v62  ;;  %v446_v5 = vld [vmem:[%s3057_s11 + $0x78] sm:$0xff]  ;;  %v2404_v19 = vld [vmem:[%s2390_s24] ss:$0 sm:$0xff]  ;;  %s2381_s27 = sld [smem:[%s3397_s0 + %s2973_s23]]   ;;  %s2974_s28 = smov 8  }
  0x14   :  { %v2446_v46 = vcombine.high %v440_v43, %v444_v44  ;;  %v2445_v49 = vcombine.low %v440_v43, %v444_v44  ;;  %v448_v52 = vld [vmem:[%s3057_s11 + $0x88] sm:$0xff]  ;;  %v2450_v6 = vcombine.high %v442_v4, %v446_v5  ;;  %v2449_v7 = vcombine.low %v442_v4, %v446_v5  ;;  %v450_v8 = vld [vmem:[%s3057_s11 + $0x98] sm:$0xff]  ;;  %v439_v37 = vld [vmem:[%s3057_s11 + $0x40] sm:$0xff]  ;;  %s2376_s2 = sld [smem:[%s3397_s0 + %s2974_s28]]   ;;  %s2976_s6 = smov 25  }
  0x15   :  { %2635 = vmatpush3.bf16.msra.mxu0 %v2840_v12  ;;  %v452_v53 = vld [vmem:[%s3057_s11 + $0xa8] sm:$0xff]  ;;  %v454_v9 = vld [vmem:[%s3057_s11 + $0xb8] sm:$0xff]  ;;  %v461_v61 = vld [vmem:[%s3057_s11 + $0xf0] sm:$0xff]  ;;  %s2977_s10 = smov 15   ;;  %s2978_s14 = smov 26  }
  0x16   :  { %2617 = vmatpush3.bf16.msra.mxu1 %v242_v10  ;;  %2429 = vmatprep.subr.msk.bf16.mxu0 %vm155_vm1, %v2422_v18  ;;  %v2454_v55 = vcombine.high %v448_v52, %v452_v53  ;;  %v2453_v56 = vcombine.low %v448_v52, %v452_v53  ;;  %v456_v57 = vld [vmem:[%s3057_s11 + $0xc8] sm:$0xff]  ;;  %v2458_v10 = vcombine.high %v450_v8, %v454_v9  ;;  %v458_v12 = vld [vmem:[%s3057_s11 + $0xd8] sm:$0xff]  ;;  %v441_v52 = vld [vmem:[%s3057_s11 + $0x50] sm:$0xff]  ;;  %s2979_s19 = smov 18   ;;  %s2980_s23 = smov 27  }
  0x17   :  { %2622 = vmatprep.subr.bf16.mxu1 %v2950_v0  ;;  %v460_v58 = vld [vmem:[%s3057_s11 + $0xe8] sm:$0xff]  ;;  %v2457_v11 = vcombine.low %v450_v8, %v454_v9  ;;  %v462_v13 = vld [vmem:[%s3057_s11 + $0xf8] sm:$0xff]  ;;  %v445_v53 = vld [vmem:[%s3057_s11 + $0x70] sm:$0xff]  ;;  %s2982_s28 = smov 4   ;;  %s2400_s16 = sld [smem:[%s3397_s0 + %s2967_s1]]  }
  0x18   :  { %2637 = vmatmul.mubr.msk.bf16.vlgmr.msra.gmra.mrb[4].mxu0 %vm386_vm4, %v360_v14  ;;  %v2462_v59 = vcombine.high %v456_v57, %v460_v58  ;;  %v2461_v60 = vcombine.low %v456_v57, %v460_v58  ;;  %v2466_v14 = vcombine.high %v458_v12, %v462_v13  ;;  %v2465_v16 = vcombine.low %v458_v12, %v462_v13  ;;  %v3109_v18 = vld [vmem:[%s2380_s20 + $0x8] sm:$0xff]   ;;  %v453_v57 = vld [vmem:[%s3057_s11 + $0xb0] sm:$0xff]  ;;  %s2986_s17 = smov 33   ;;  %s2987_s21 = smov 30  }
  0x19   :  { %590 = vmatprep.mubr.bf16.mxu0 %v2958_v15  ;;  %559 = vmatpush1.bf16.msra.mxu0 %v500_v20  ;;  %v2447_v58 = vcombine.low %v441_v52, %v445_v53  ;;  %s2401_s20 = sld [smem:[%s3397_s0 + %s2986_s17]]  }
  0x1a   :  { %2433 = vmatprep.subr.msk.bf16.mxu0 %vm155_vm1, %v2426_v32  ;;  %s2398_s24 = sld [smem:[%s3397_s0 + %s2987_s21]]  }
  0x1f   :  { %2350 = vst [vmem:[%s2401_s20] sm:$0x3] %v2950_v0 }
  0x20   :  { %2430 = vmatmul.mubr.msk.bf16.vlgmr.msra.gmra.mrb[8].mxu0 %vm151_vm2, %v3040_v21 }
  0x21   :  { %672 = vmatprep.mubr.bf16.mxu0 %v2958_v15  ;;  %641 = vmatpush1.bf16.msra.mxu0 %v512_v34  ;;  %v435_v34 = vld [vmem:[%s3057_s11 + $0x20] sm:$0xff] }
  0x22   :  { %886 = vmatprep.subr.bf16.mxu0 %v2438_v38  ;;  %v2436_v36 = vcombine.high %v431_v33, %v435_v34  ;;  %v443_v38 = vld [vmem:[%s3057_s11 + $0x60] sm:$0xff] }
  0x23   :  { %v2443_v43 = vcombine.low %v439_v37, %v443_v38 }
  0x28   :  { %2434 = vmatmul.mubr.msk.bf16.vlgmr.msra.gmra.mrb[12].mxu0 %vm151_vm2, %v3040_v21 }
  0x29   :  { %887 = vmatpush1.bf16.msra.mxu0 %v2437_v40  ;;  %918 = vmatprep.mubr.bf16.mxu0 %v2958_v15  ;;  %v2444_v40 = vcombine.high %v439_v37, %v443_v38 }
  0x2a   :  { %888 = vmatprep.subr.bf16.mxu0 %v2446_v46  ;;  %v459_v46 = vld [vmem:[%s3057_s11 + $0xe0] sm:$0xff] }
  0x2d   :  { %889 = vmatpush1.bf16.msra.mxu0 %v2445_v49  ;;  %v433_v49 = vld [vmem:[%s3057_s11 + $0x10] sm:$0xff] }
  0x2e   :  { %890 = vmatprep.subr.bf16.mxu0 %v2454_v55  ;;  %v2448_v55 = vcombine.high %v441_v52, %v445_v53 }
  0x31   :  { %891 = vmatpush1.bf16.msra.mxu0 %v2453_v56  ;;  %v449_v56 = vld [vmem:[%s3057_s11 + $0x90] sm:$0xff] }
  0x32   :  { %892 = vmatprep.subr.bf16.mxu0 %v2462_v59  ;;  %v2456_v59 = vcombine.high %v449_v56, %v453_v57  ;;  %v2455_v62 = vcombine.low %v449_v56, %v453_v57 }
  0x35   :  { %893 = vmatpush1.bf16.msra.mxu0 %v2461_v60  ;;  %v457_v60 = vld [vmem:[%s3057_s11 + $0xd0] sm:$0xff] }
  0x36   :  { %968 = vmatprep.subr.bf16.mxu0 %v2442_v63  ;;  %v2464_v63 = vcombine.high %v457_v60, %v461_v61 }
  0xdf   :  { %v193_v23 = vpop.f32.mrb[0].mxu0 }
  0xe0   :  { %v194_v24 = vadd.f32 %v2402_v22, %v193_v23  ;;  %v2608_v25 = vpop.f32.mrb[1].mxu0 }
  0xe1   :  { %v196_v26 = vpop.f32.mrb[2].mxu0 }
  0xe2   :  { %v199_v27 = vmax.f32 %v194_v24, 0.0  ;;  %v2609_v28 = vpop.f32.mrb[3].mxu0  ;;  %v2419_v24 = vcombine.low %v3075_v48, %v3075_v48  ;;  %v467_v26 = vld [vmem:[%s3030_s25 + $0x10] sm:$0xff]  ;;  %s2965_s25 = smov 11  }
  0xe3   :  { %v2423_v32 = vcombine.low %v467_v26, %v467_v26  ;;  %s2379_s29 = sld [smem:[%s3397_s0 + %s2965_s25]]  }
  0xe4   :  { %v207_v29 = vpack.c.bf16 %v199_v27, %v199_v27  ;;  %v494_v30 = vsel %vm155_vm1, %v2419_v24, 0 }
  0xe5   :  { %v506_v35 = vsel %vm155_vm1, %v2423_v32, 0 }
  0xe6   :  { %2619 = vmatmul.mubr.msk.bf16.vlgmr.msra.gmra.mrb[0].mxu1 %vm236_vm5, %v207_v29 }
  0xe7   :  { %2626 = vmatprep.mubr.msk.bf16.mxu1 %vm2952_vm0, %v2950_v0  ;;  %2623 = vmatpush3.bf16.msra.mxu1 %v2843_v31  ;;  %v2424_v31 = vcombine.high %v467_v26, %v467_v26 }
  0xe8   :  { %2624 = vmatprep.subr.bf16.mxu1 %v2950_v0 }
  0xe9   :  { %v1009_v26 = vld [vmem:[%s2379_s29] sm:$0xff] }
  0xeb   :  { %2625 = vmatpush3.bf16.msra.mxu1 %v311_v39  ;;  %v424_v42 = vpop.f32.mrb[4].mxu0  ;;  %v2435_v39 = vcombine.low %v431_v33, %v435_v34 }
  0xec   :  { %v425_v45 = vadd.f32 %v2414_v41, %v424_v42  ;;  %v2638_v47 = vpop.f32.mrb[5].mxu0  ;;  %2427 = vmatprep.subr.msk.bf16.mxu1 %vm155_vm1, %v2420_v51  ;;  %v447_v41 = vld [vmem:[%s3057_s11 + $0x80] sm:$0xff] }
  0xed   :  { %v427_v50 = vpop.f32.mrb[6].mxu0  ;;  %v451_v42 = vld [vmem:[%s3057_s11 + $0xa0] sm:$0xff] }
  0xee   :  { %2878 = vtanh.f32 %v425_v45  ;;  %v2639_v54 = vpop.f32.mrb[7].mxu0  ;;  %v2452_v44 = vcombine.high %v447_v41, %v451_v42  ;;  %v455_v45 = vld [vmem:[%s3057_s11 + $0xc0] sm:$0xff]  ;;  %v2451_v47 = vcombine.low %v447_v41, %v451_v42  ;;  %v437_v50 = vld [vmem:[%s3057_s11 + $0x30] sm:$0xff] }
  0xef   :  { %v2460_v48 = vcombine.high %v455_v45, %v459_v46  ;;  %v2440_v51 = vcombine.high %v433_v49, %v437_v50  ;;  %v2439_v54 = vcombine.low %v433_v49, %v437_v50 }
  0xf8   :  { %v2879_v1 = vpop.eup %2878 }
  0xf9   :  { %v3086_v3 = vpack.c.bf16 %v2879_v1, %v2879_v1  ;;  %v2463_v1 = vcombine.low %v457_v60, %v461_v61 }
  0xfb   :  { %2468 = vmatmul.mubr.msk.bf16.vlgmr.msra.gmra.mrb[16].mxu0 %vm841_vm7, %v3086_v3 }
  0xfc   :  { %969 = vmatpush1.bf16.msra.mxu0 %v2441_v2  ;;  %1000 = vmatprep.mubr.bf16.mxu0 %v2958_v15  ;;  %v592_v2 = vpop.f32.mrb[8].mxu0 }
  0xfd   :  { %970 = vmatprep.subr.bf16.mxu0 %v2450_v6 }
 0x100   :  { %971 = vmatpush1.bf16.msra.mxu0 %v2449_v7 }
 0x101   :  { %972 = vmatprep.subr.bf16.mxu0 %v2458_v10 }
 0x104   :  { %973 = vmatpush1.bf16.msra.mxu0 %v2457_v11 }
 0x105   :  { %974 = vmatprep.subr.bf16.mxu0 %v2466_v14 }
 0x108   :  { %975 = vmatpush1.bf16.msra.mxu0 %v2465_v16  ;;  %v1011_v16 = vlaneseq }
 0x109   :  { %2648 = vmatprep.subr.bf16.mxu0 %v2950_v0 }
 0x10b   :  { %2470 = vmatmul.mubr.msk.bf16.vlgmr.msra.gmra.mrb[20].mxu0 %vm841_vm7, %v3086_v3 }
 0x10c   :  { %2652 = vmatprep.mubr.msk.bf16.mxu0 %vm2952_vm0, %v2950_v0  ;;  %2649 = vmatpush3.bf16.msra.mxu0 %v3105_v17 }
 0x10d   :  { %2650 = vmatprep.subr.bf16.mxu0 %v2950_v0 }
 0x110   :  { %2651 = vmatpush3.bf16.msra.mxu0 %v3109_v18 }
 0x111   :  { %2664 = vmatprep.subr.bf16.mxu0 %v2950_v0 }
 0x1b9   :  { %v278_v20 = vpop.f32.mrb[0].mxu1 }
 0x1ba   :  { %v279_v22 = vadd.f32 %v2404_v19, %v278_v20  ;;  %v2620_v23 = vpop.f32.mrb[1].mxu1  ;;  %v1012_v19 = vshrl.u32 %v1011_v16, 7 }
 0x1bb   :  { %v281_v25 = vpop.f32.mrb[2].mxu1 }
 0x1bc   :  { %v284_v27 = vmax.f32 %v279_v22, 0.0  ;;  %v2621_v28 = vpop.f32.mrb[3].mxu1  ;;  %v1037_v32 = vsub.s32 6, %v1012_v19  ;;  %v1041_v33 = vsub.s32 7, %v1012_v19 }
 0x1bd   :  { %v1021_v28 = vsub.s32 2, %v1012_v19 }
 0x1be   :  { %v3119_v29 = vpack.c.bf16 %v284_v27, %v284_v27  ;;  %v1017_v27 = vsub.s32 1, %v1012_v19  ;;  %v1038_v37 = vrot.slane %v1009_v26, %v1037_v32  ;;  %v1042_v38 = vrot.slane %v1009_v26, %v1041_v33 }
 0x1c0   :  { %2627 = vmatmul.mubr.msk.bf16.vlgmr.msra.gmra.mrb[4].mxu1 %vm305_vm8, %v3119_v29  ;;  %v1018_v34 = vrot.slane %v1009_v26, %v1017_v27 }
 0x1c1   :  { %518 = vmatpush1.bf16.msra.mxu1 %v494_v30  ;;  %549 = vmatprep.mubr.bf16.mxu1 %v2958_v15  ;;  %v1025_v30 = vsub.s32 3, %v1012_v19 }
 0x1c2   :  { %2431 = vmatprep.subr.msk.bf16.mxu1 %vm155_vm1, %v2424_v31 }
 0x1c8   :  { %2428 = vmatmul.mubr.msk.bf16.vlgmr.msra.gmra.mrb[8].mxu1 %vm151_vm2, %v3040_v21 }
 0x1c9   :  { %600 = vmatpush1.bf16.msra.mxu1 %v506_v35  ;;  %631 = vmatprep.mubr.bf16.mxu1 %v2958_v15  ;;  %v1022_v35 = vrot.slane %v1009_v26, %v1021_v28 }
 0x1ca   :  { %845 = vmatprep.subr.bf16.mxu1 %v2436_v36  ;;  %v1026_v36 = vrot.slane %v1009_v26, %v1025_v30 }
 0x1d0   :  { %2432 = vmatmul.mubr.msk.bf16.vlgmr.msra.gmra.mrb[12].mxu1 %vm151_vm2, %v3040_v21  ;;  %v2459_v21 = vcombine.low %v455_v45, %v459_v46  ;;  %vm2357_vm2 = vcmask 33800  }
 0x1d1   :  { %846 = vmatpush1.bf16.msra.mxu1 %v2435_v39  ;;  %877 = vmatprep.mubr.bf16.mxu1 %v2958_v15 }
 0x1d2   :  { %847 = vmatprep.subr.bf16.mxu1 %v2444_v40 }
 0x1d5   :  { %848 = vmatpush1.bf16.msra.mxu1 %v2443_v43  ;;  %v1029_v43 = vsub.s32 4, %v1012_v19 }
 0x1d6   :  { %849 = vmatprep.subr.bf16.mxu1 %v2452_v44  ;;  %v1033_v44 = vsub.s32 5, %v1012_v19 }
 0x1d7   :  { %v1030_v45 = vrot.slane %v1009_v26, %v1029_v43 }
 0x1d8   :  { %v1034_v46 = vrot.slane %v1009_v26, %v1033_v44 }
 0x1d9   :  { %850 = vmatpush1.bf16.msra.mxu1 %v2451_v47 }
 0x1da   :  { %851 = vmatprep.subr.bf16.mxu1 %v2460_v48 }
 0x1dd   :  { %852 = vmatpush1.bf16.msra.mxu1 %v2459_v21 }
 0x1de   :  { %927 = vmatprep.subr.bf16.mxu1 %v2440_v51 }
 0x1e0   :  { %2467 = vmatmul.mubr.msk.bf16.vlgmr.msra.gmra.mrb[16].mxu1 %vm841_vm7, %v3086_v3 }
 0x1e1   :  { %928 = vmatpush1.bf16.msra.mxu1 %v2439_v54  ;;  %959 = vmatprep.mubr.bf16.mxu1 %v2958_v15 }
 0x1e2   :  { %929 = vmatprep.subr.bf16.mxu1 %v2448_v55 }
 0x1e5   :  { %930 = vmatpush1.bf16.msra.mxu1 %v2447_v58 }
 0x1e6   :  { %931 = vmatprep.subr.bf16.mxu1 %v2456_v59 }
 0x1e9   :  { %932 = vmatpush1.bf16.msra.mxu1 %v2455_v62 }
 0x1ea   :  { %933 = vmatprep.subr.bf16.mxu1 %v2464_v63 }
 0x1ed   :  { %934 = vmatpush1.bf16.msra.mxu1 %v2463_v1 }
 0x1ee   :  { %2640 = vmatprep.subr.bf16.mxu1 %v2950_v0 }
 0x1f0   :  { %2469 = vmatmul.mubr.msk.bf16.vlgmr.msra.gmra.mrb[20].mxu1 %vm841_vm7, %v3086_v3  ;;  %v594_v3 = vpop.f32.mrb[9].mxu0 }
 0x1f1   :  { %2641 = vmatpush3.bf16.msra.mxu1 %v3105_v17  ;;  %2644 = vmatprep.mubr.msk.bf16.mxu1 %vm2952_vm0, %v2950_v0  ;;  %v596_v4 = vpop.f32.mrb[10].mxu0 }
 0x1f2   :  { %2642 = vmatprep.subr.bf16.mxu1 %v2950_v0  ;;  %v597_v5 = vpop.f32.mrb[11].mxu0 }
 0x1f3   :  { %v674_v6 = vpop.f32.mrb[12].mxu0 }
 0x1f4   :  { %v676_v7 = vpop.f32.mrb[13].mxu0 }
 0x1f5   :  { %2643 = vmatpush3.bf16.msra.mxu1 %v3109_v18  ;;  %v678_v8 = vpop.f32.mrb[14].mxu0 }
 0x1f6   :  { %2656 = vmatprep.subr.bf16.mxu1 %v2950_v0  ;;  %v679_v9 = vpop.f32.mrb[15].mxu0 }
 0x1f8   :  { %2645 = vmatmul.mubr.bf16.vlgmr.msra.gmra.mrb[24].mxu1 %v2958_v15  ;;  %v920_v15 = vpop.f32.mrb[16].mxu0 }
 0x1f9   :  { %2657 = vmatpush3.bf16.msra.mxu1 %v3105_v17  ;;  %2660 = vmatprep.mubr.msk.bf16.mxu1 %vm2952_vm0, %v2950_v0  ;;  %v921_v10 = vadd.f32 %v920_v15, %v592_v2  ;;  %v922_v11 = vpop.f32.mrb[17].mxu0  ;;  %v1013_v2 = vsub.s32 0, %v1012_v19 }
 0x1fa   :  { %2658 = vmatprep.subr.bf16.mxu1 %v2950_v0  ;;  %v923_v12 = vadd.f32 %v922_v11, %v594_v3  ;;  %v924_v13 = vpop.f32.mrb[18].mxu0 }
 0x1fb   :  { %v925_v14 = vpop.f32.mrb[19].mxu0  ;;  %v3171_v39 = vadd.f32 %v1022_v35, %v921_v10  ;;  %v1014_v9 = vrot.slane %v1009_v26, %v1013_v2 }
 0x1fc   :  { %v1002_v20 = vpop.f32.mrb[20].mxu0  ;;  %v3173_v40 = vadd.f32 %v1026_v36, %v923_v12 }
 0x1fd   :  { %2659 = vmatpush3.bf16.msra.mxu1 %v3109_v18  ;;  %v1003_v22 = vadd.f32 %v1002_v20, %v674_v6  ;;  %v1004_v23 = vpop.f32.mrb[21].mxu0 }
 0x1fe   :  { %2672 = vmatprep.subr.bf16.mxu1 %v2950_v0  ;;  %v1005_v24 = vadd.f32 %v1004_v23, %v676_v7  ;;  %v1006_v25 = vpop.f32.mrb[22].mxu0 }
 0x1ff   :  { %v1007_v31 = vpop.f32.mrb[23].mxu0  ;;  %v3175_v41 = vadd.f32 %v1038_v37, %v1003_v22 }
 0x200   :  { %v3177_v42 = vadd.f32 %v1042_v38, %v1005_v24 }
 0x293   :  { %v3179_v47 = vpop.f32.mrb[4].mxu1 }
 0x294   :  { %v2628_v48 = vpop.f32.mrb[5].mxu1 }
 0x295   :  { %v350_v49 = vpop.f32.mrb[6].mxu1 }
 0x296   :  { %v2629_v50 = vpop.f32.mrb[7].mxu1 }
 0x29b   :  { %v551_v21 = vpop.f32.mrb[8].mxu1 }
 0x29c   :  { %v553_v51 = vpop.f32.mrb[9].mxu1 }
 0x29d   :  { %v555_v52 = vpop.f32.mrb[10].mxu1 }
 0x29e   :  { %v556_v53 = vpop.f32.mrb[11].mxu1 }
 0x2a3   :  { %v633_v54 = vpop.f32.mrb[12].mxu1 }
 0x2a4   :  { %v635_v55 = vpop.f32.mrb[13].mxu1 }
 0x2a5   :  { %v637_v56 = vpop.f32.mrb[14].mxu1 }
 0x2a6   :  { %v638_v57 = vpop.f32.mrb[15].mxu1 }
 0x2b3   :  { %v879_v58 = vpop.f32.mrb[16].mxu1 }
 0x2b4   :  { %v880_v59 = vadd.f32 %v879_v58, %v551_v21  ;;  %v881_v60 = vpop.f32.mrb[17].mxu1 }
 0x2b5   :  { %v882_v61 = vadd.f32 %v881_v60, %v553_v51  ;;  %v883_v62 = vpop.f32.mrb[18].mxu1 }
 0x2b6   :  { %v884_v63 = vpop.f32.mrb[19].mxu1  ;;  %v1051_v11 = vadd.f32 %v1014_v9, %v880_v59 }
 0x2b7   :  { %v1052_v1 = vadd.f32 %v1018_v34, %v882_v61 }
 0x2c3   :  { %v961_v3 = vpop.f32.mrb[20].mxu1 }
 0x2c4   :  { %v962_v4 = vadd.f32 %v961_v3, %v633_v54  ;;  %v963_v5 = vpop.f32.mrb[21].mxu1 }
 0x2c5   :  { %v964_v6 = vadd.f32 %v963_v5, %v635_v55  ;;  %v965_v7 = vpop.f32.mrb[22].mxu1 }
 0x2c6   :  { %v966_v8 = vpop.f32.mrb[23].mxu1  ;;  %v3181_v15 = vadd.f32 %v1030_v45, %v962_v4 }
 0x2c7   :  { %v3183_v10 = vadd.f32 %v1034_v46, %v964_v6 }
 0x2cb   :  { %v1113_v12 = vpop.f32.mrb[24].mxu1 }
 0x2cc   :  { %v1119_v13 = vadd.f32 %v1113_v12, %v1051_v11  ;;  %v2646_v14 = vpop.f32.mrb[25].mxu1 }
 0x2cd   :  { %v1116_v16 = vpop.f32.mrb[26].mxu1 }
 0x2ce   :  { %2880 = vtanh.f32 %v1119_v13  ;;  %v2647_v20 = vpop.f32.mrb[27].mxu1  ;;  %v2473_v19 = vmul.f32 -1.442695, %v1119_v13 }
 0x2d0   :  { %2882 = vpow2.f32 %v2473_v19 }
 0x2d8   :  { %v2881_v22 = vpop.eup %2880 }
 0x2d9   :  { %1129 = vrot.lane.b32.xlu0 %v2881_v22, %s2966_s30 }
 0x2da   :  { %v2883_v23 = vpop.eup %2882 }
 0x2db   :  { %v1123_v24 = vadd.f32 1.0, %v2883_v23 }
 0x2dd   :  { %2884 = vrcp.f32 %v1123_v24 }
 0x2e7   :  { %v2885_v25 = vpop.eup %2884 }
 0x2e8   :  { %v1127_v28 = vmul.f32 0.0, %v2885_v25 }
 0x34b   :  { %v1130_v26 = vpop.permute.xlu0 %1129 }
 0x34c   :  { %v1132_v27 = vmul.f32 %v2885_v25, %v1130_v26 }
 0x34e   :  { %1134 = vrot.lane.b32.xlu0 %v1132_v27, %s2967_s1 }
 0x3c0   :  { %v1135_v30 = vpop.permute.xlu0 %1134 }
 0x3c1   :  { %v1137_v31 = vadd.f32 %v1135_v30, %v1127_v28 }
 0x3c3   :  { %2886 = vtanh.f32 %v1137_v31 }
 0x3cd   :  { %v2887_v32 = vpop.eup %2886 }
 0x3ce   :  { %1140 = vrot.lane.b32.xlu1 %v2887_v32, %s2966_s30 }
 0x440   :  { %v1141_v33 = vpop.permute.xlu1 %1140 }
 0x441   :  { %v1143_v34 = vmul.f32 %v2885_v25, %v1141_v33 }
 0x443   :  { %v1144_v35 = vpack.c.bf16 %v1143_v34, %v1143_v34 }
 0x445   :  { %1146 = vrot.lane.b32.xlu1 %v1144_v35, %s2967_s1 }
 0x4b7   :  { %v1147_v36 = vpop.permute.xlu1 %1146 }
 0x4b8   :  { %2653 = vmatmul.mubr.msk.bf16.vlgmr.msra.gmra.mrb[24].mxu0 %vm1075_vm9, %v1147_v36 }
 0x4b9   :  { %2665 = vmatpush3.bf16.msra.mxu0 %v3105_v17  ;;  %2668 = vmatprep.mubr.msk.bf16.mxu0 %vm2952_vm0, %v2950_v0 }
 0x4ba   :  { %2666 = vmatprep.subr.bf16.mxu0 %v2950_v0 }
 0x4bd   :  { %2667 = vmatpush3.bf16.msra.mxu0 %v3109_v18 }
 0x4be   :  { %2680 = vmatprep.subr.bf16.mxu0 %v2950_v0 }
 0x58b   :  { %v1185_v37 = vpop.f32.mrb[24].mxu0 }
 0x58c   :  { %v1191_v38 = vadd.f32 %v1185_v37, %v1052_v1  ;;  %v2654_v43 = vpop.f32.mrb[25].mxu0 }
 0x58d   :  { %v1188_v44 = vpop.f32.mrb[26].mxu0 }
 0x58e   :  { %2888 = vtanh.f32 %v1191_v38  ;;  %v2655_v45 = vpop.f32.mrb[27].mxu0  ;;  %v2475_v48 = vmul.f32 -1.442695, %v1191_v38 }
 0x590   :  { %2890 = vpow2.f32 %v2475_v48 }
 0x598   :  { %v2889_v46 = vpop.eup %2888 }
 0x599   :  { %1201 = vrot.lane.b32.xlu0 %v2889_v46, %s2966_s30 }
 0x59a   :  { %v2891_v49 = vpop.eup %2890 }
 0x59b   :  { %v1195_v50 = vadd.f32 1.0, %v2891_v49 }
 0x59d   :  { %2892 = vrcp.f32 %v1195_v50 }
 0x5a7   :  { %v2893_v21 = vpop.eup %2892 }
 0x5a8   :  { %v1199_v53 = vmul.f32 %v2893_v21, %v1137_v31 }
 0x60b   :  { %v1202_v51 = vpop.permute.xlu0 %1201 }
 0x60c   :  { %v1204_v52 = vmul.f32 %v2893_v21, %v1202_v51 }
 0x60e   :  { %1206 = vrot.lane.b32.xlu1 %v1204_v52, %s2967_s1 }
 0x680   :  { %v1207_v54 = vpop.permute.xlu1 %1206 }
 0x681   :  { %v1209_v55 = vadd.f32 %v1207_v54, %v1199_v53 }
 0x683   :  { %2894 = vtanh.f32 %v1209_v55 }
 0x68d   :  { %v2895_v56 = vpop.eup %2894 }
 0x68e   :  { %1212 = vrot.lane.b32.xlu0 %v2895_v56, %s2966_s30 }
 0x700   :  { %v1213_v57 = vpop.permute.xlu0 %1212 }
 0x701   :  { %v1215_v58 = vmul.f32 %v2893_v21, %v1213_v57 }
 0x703   :  { %v1216_v59 = vpack.c.bf16 %v1215_v58, %v1215_v58 }
 0x705   :  { %1218 = vrot.lane.b32.xlu1 %v1216_v59, %s2967_s1 }
 0x777   :  { %v1219_v60 = vpop.permute.xlu1 %1218 }
 0x778   :  { %2661 = vmatmul.mubr.msk.bf16.vlgmr.msra.gmra.mrb[28].mxu1 %vm1075_vm9, %v1219_v60 }
 0x779   :  { %2673 = vmatpush3.bf16.msra.mxu1 %v3105_v17  ;;  %2676 = vmatprep.mubr.msk.bf16.mxu1 %vm2952_vm0, %v2950_v0 }
 0x77a   :  { %2674 = vmatprep.subr.bf16.mxu1 %v2950_v0 }
 0x77d   :  { %2675 = vmatpush3.bf16.msra.mxu1 %v3109_v18 }
 0x77e   :  { %2688 = vmatprep.subr.bf16.mxu1 %v2950_v0 }
 0x84b   :  { %v1257_v61 = vpop.f32.mrb[28].mxu1 }
 0x84c   :  { %v1263_v62 = vadd.f32 %v1257_v61, %v3171_v39  ;;  %v2662_v63 = vpop.f32.mrb[29].mxu1 }
 0x84d   :  { %v1260_v1 = vpop.f32.mrb[30].mxu1 }
 0x84e   :  { %2896 = vtanh.f32 %v1263_v62  ;;  %v2663_v2 = vpop.f32.mrb[31].mxu1  ;;  %v2477_v4 = vmul.f32 -1.442695, %v1263_v62 }
 0x850   :  { %2898 = vpow2.f32 %v2477_v4 }
 0x858   :  { %v2897_v3 = vpop.eup %2896 }
 0x859   :  { %1273 = vrot.lane.b32.xlu0 %v2897_v3, %s2966_s30 }
 0x85a   :  { %v2899_v5 = vpop.eup %2898 }
 0x85b   :  { %v1267_v6 = vadd.f32 1.0, %v2899_v5 }
 0x85d   :  { %2900 = vrcp.f32 %v1267_v6 }
 0x867   :  { %v2901_v7 = vpop.eup %2900 }
 0x868   :  { %v1271_v11 = vmul.f32 %v2901_v7, %v1209_v55 }
 0x8cb   :  { %v1274_v8 = vpop.permute.xlu0 %1273 }
 0x8cc   :  { %v1276_v9 = vmul.f32 %v2901_v7, %v1274_v8 }
 0x8ce   :  { %1278 = vrot.lane.b32.xlu1 %v1276_v9, %s2967_s1 }
 0x940   :  { %v1279_v12 = vpop.permute.xlu1 %1278 }
 0x941   :  { %v1281_v39 = vadd.f32 %v1279_v12, %v1271_v11 }
 0x943   :  { %2902 = vtanh.f32 %v1281_v39 }
 0x94d   :  { %v2903_v13 = vpop.eup %2902 }
 0x94e   :  { %1284 = vrot.lane.b32.xlu0 %v2903_v13, %s2966_s30 }
 0x9c0   :  { %v1285_v14 = vpop.permute.xlu0 %1284 }
 0x9c1   :  { %v1287_v16 = vmul.f32 %v2901_v7, %v1285_v14 }
 0x9c3   :  { %v1288_v20 = vpack.c.bf16 %v1287_v16, %v1287_v16 }
 0x9c5   :  { %1290 = vrot.lane.b32.xlu1 %v1288_v20, %s2967_s1 }
 0xa37   :  { %v1291_v22 = vpop.permute.xlu1 %1290 }
 0xa38   :  { %2669 = vmatmul.mubr.msk.bf16.vlgmr.msra.gmra.mrb[28].mxu0 %vm1075_vm9, %v1291_v22 }
 0xa39   :  { %2681 = vmatpush3.bf16.msra.mxu0 %v3105_v17  ;;  %2684 = vmatprep.mubr.msk.bf16.mxu0 %vm2952_vm0, %v2950_v0 }
 0xa3a   :  { %2682 = vmatprep.subr.bf16.mxu0 %v2950_v0 }
 0xa3d   :  { %2683 = vmatpush3.bf16.msra.mxu0 %v3109_v18 }
 0xa3e   :  { %2696 = vmatprep.subr.bf16.mxu0 %v2950_v0 }
 0xb0b   :  { %v1329_v19 = vpop.f32.mrb[28].mxu0 }
 0xb0c   :  { %v1335_v23 = vadd.f32 %v1329_v19, %v3173_v40  ;;  %v2670_v24 = vpop.f32.mrb[29].mxu0 }
 0xb0d   :  { %v1332_v25 = vpop.f32.mrb[30].mxu0 }
 0xb0e   :  { %2904 = vtanh.f32 %v1335_v23  ;;  %v2671_v26 = vpop.f32.mrb[31].mxu0  ;;  %v2479_v28 = vmul.f32 -1.442695, %v1335_v23 }
 0xb10   :  { %2906 = vpow2.f32 %v2479_v28 }
 0xb18   :  { %v2905_v27 = vpop.eup %2904 }
 0xb19   :  { %1345 = vrot.lane.b32.xlu0 %v2905_v27, %s2966_s30 }
 0xb1a   :  { %v2907_v30 = vpop.eup %2906 }
 0xb1b   :  { %v1339_v31 = vadd.f32 1.0, %v2907_v30 }
 0xb1d   :  { %2908 = vrcp.f32 %v1339_v31 }
 0xb27   :  { %v2909_v32 = vpop.eup %2908 }
 0xb28   :  { %v1343_v35 = vmul.f32 %v2909_v32, %v1281_v39 }
 0xb8b   :  { %v1346_v33 = vpop.permute.xlu0 %1345 }
 0xb8c   :  { %v1348_v34 = vmul.f32 %v2909_v32, %v1346_v33 }
 0xb8e   :  { %1350 = vrot.lane.b32.xlu1 %v1348_v34, %s2967_s1 }
 0xc00   :  { %v1351_v36 = vpop.permute.xlu1 %1350 }
 0xc01   :  { %v1353_v40 = vadd.f32 %v1351_v36, %v1343_v35 }
 0xc03   :  { %2910 = vtanh.f32 %v1353_v40 }
 0xc0d   :  { %v2911_v37 = vpop.eup %2910 }
 0xc0e   :  { %1356 = vrot.lane.b32.xlu0 %v2911_v37, %s2966_s30 }
 0xc80   :  { %v1357_v38 = vpop.permute.xlu0 %1356 }
 0xc81   :  { %v1359_v43 = vmul.f32 %v2909_v32, %v1357_v38 }
 0xc83   :  { %v1360_v44 = vpack.c.bf16 %v1359_v43, %v1359_v43 }
 0xc85   :  { %1362 = vrot.lane.b32.xlu1 %v1360_v44, %s2967_s1 }
 0xcf7   :  { %v1363_v45 = vpop.permute.xlu1 %1362 }
 0xcf8   :  { %2677 = vmatmul.mubr.msk.bf16.vlgmr.msra.gmra.mrb[32].mxu1 %vm1075_vm9, %v1363_v45 }
 0xcf9   :  { %2689 = vmatpush3.bf16.msra.mxu1 %v3105_v17  ;;  %2692 = vmatprep.mubr.msk.bf16.mxu1 %vm2952_vm0, %v2950_v0 }
 0xcfa   :  { %2690 = vmatprep.subr.bf16.mxu1 %v2950_v0 }
 0xcfd   :  { %2691 = vmatpush3.bf16.msra.mxu1 %v3109_v18 }
 0xcfe   :  { %2704 = vmatprep.subr.bf16.mxu1 %v2950_v0 }
 0xdcb   :  { %v1401_v46 = vpop.f32.mrb[32].mxu1 }
 0xdcc   :  { %v1407_v48 = vadd.f32 %v1401_v46, %v3181_v15  ;;  %v2678_v49 = vpop.f32.mrb[33].mxu1 }
 0xdcd   :  { %v1404_v50 = vpop.f32.mrb[34].mxu1 }
 0xdce   :  { %2912 = vtanh.f32 %v1407_v48  ;;  %v2679_v21 = vpop.f32.mrb[35].mxu1  ;;  %v2481_v52 = vmul.f32 -1.442695, %v1407_v48 }
 0xdd0   :  { %2914 = vpow2.f32 %v2481_v52 }
 0xdd8   :  { %v2913_v51 = vpop.eup %2912 }
 0xdd9   :  { %1417 = vrot.lane.b32.xlu0 %v2913_v51, %s2966_s30 }
 0xdda   :  { %v2915_v53 = vpop.eup %2914 }
 0xddb   :  { %v1411_v54 = vadd.f32 1.0, %v2915_v53 }
 0xddd   :  { %2916 = vrcp.f32 %v1411_v54 }
 0xde7   :  { %v2917_v55 = vpop.eup %2916 }
 0xde8   :  { %v1415_v58 = vmul.f32 %v2917_v55, %v1353_v40 }
 0xe4b   :  { %v1418_v56 = vpop.permute.xlu0 %1417 }
 0xe4c   :  { %v1420_v57 = vmul.f32 %v2917_v55, %v1418_v56 }
 0xe4e   :  { %1422 = vrot.lane.b32.xlu1 %v1420_v57, %s2967_s1  ;;  %v1648_v57 = vld [vmem:[%s2370_s9] sm:$0x3]  ;;  %s2393_s9 = sld [smem:[%s3397_s0 + %s2976_s6]]  }
 0xec0   :  { %v1423_v59 = vpop.permute.xlu1 %1422 }
 0xec1   :  { %v1425_v15 = vadd.f32 %v1423_v59, %v1415_v58  ;;  %v1652_v58 = vpack.c.bf16 %v1648_v57, %v1648_v57 }
 0xec3   :  { %2918 = vtanh.f32 %v1425_v15 }
 0xecd   :  { %v2919_v60 = vpop.eup %2918 }
 0xece   :  { %1428 = vrot.lane.b32.xlu0 %v2919_v60, %s2966_s30 }
 0xf40   :  { %v1429_v61 = vpop.permute.xlu0 %1428 }
 0xf41   :  { %v1431_v62 = vmul.f32 %v2917_v55, %v1429_v61  ;;  %v2853_v55 = vld [vmem:[%s2375_s5] sm:$0xff]  }
 0xf43   :  { %v1432_v63 = vpack.c.bf16 %v1431_v62, %v1431_v62 }
 0xf45   :  { %1434 = vrot.lane.b32.xlu1 %v1432_v63, %s2967_s1 }
 0xfb7   :  { %v1435_v1 = vpop.permute.xlu1 %1434 }
 0xfb8   :  { %2685 = vmatmul.mubr.msk.bf16.vlgmr.msra.gmra.mrb[32].mxu0 %vm1075_vm9, %v1435_v1  ;;  %v2410_v1 = vld [vmem:[%s2392_s13] ss:$0 sm:$0xff]  ;;  %s2383_s13 = sld [smem:[%s3397_s0 + %s2977_s10]]  }
 0xfb9   :  { %2697 = vmatpush3.bf16.msra.mxu0 %v3105_v17  ;;  %2700 = vmatprep.mubr.msk.bf16.mxu0 %vm2952_vm0, %v2950_v0 }
 0xfba   :  { %2698 = vmatprep.subr.bf16.mxu0 %v2950_v0 }
 0xfbd   :  { %2699 = vmatpush3.bf16.msra.mxu0 %v3109_v18 }
 0xfbe   :  { %2712 = vmatprep.subr.bf16.mxu0 %v2950_v0 }
0x108b   :  { %v1473_v2 = vpop.f32.mrb[32].mxu0 }
0x108c   :  { %v1479_v3 = vadd.f32 %v1473_v2, %v3183_v10  ;;  %v2686_v4 = vpop.f32.mrb[33].mxu0 }
0x108d   :  { %v1476_v5 = vpop.f32.mrb[34].mxu0  ;;  %v2856_v4 = vld [vmem:[%s2382_s18 + $0x8] sm:$0xff]  }
0x108e   :  { %2920 = vtanh.f32 %v1479_v3  ;;  %v2687_v6 = vpop.f32.mrb[35].mxu0  ;;  %v2483_v17 = vmul.f32 -1.442695, %v1479_v3  ;;  %v2855_v3 = vld [vmem:[%s2382_s18] sm:$0xff]   ;;  %v348_v5 = vadd.f32 %v2410_v1, %v3179_v47  ;;  %s2394_s18 = sld [smem:[%s3397_s0 + %s2978_s14]]  }
0x108f   :  { %v2858_v6 = vld [vmem:[%s2381_s27] sm:$0xff]  }
0x1090   :  { %2922 = vpow2.f32 %v2483_v17  ;;  %v2488_v47 = vld [vmem:[%s2376_s2] ss:$0 sm:$0xff]  ;;  %s2372_s2 = sld [smem:[%s3397_s0 + %s2982_s28]]  }
0x1098   :  { %v2921_v7 = vpop.eup %2920 }
0x1099   :  { %1489 = vrot.lane.b32.xlu0 %v2921_v7, %s2966_s30  ;;  %v2860_v7 = vld [vmem:[%s2381_s27 + $0x8] sm:$0xff]   ;;  %s2395_s27 = sld [smem:[%s3397_s0 + %s2980_s23]]  }
0x109a   :  { %v2923_v8 = vpop.eup %2922 }
0x109b   :  { %v1483_v9 = vadd.f32 1.0, %v2923_v8 }
0x109d   :  { %2924 = vrcp.f32 %v1483_v9 }
0x10a7   :  { %v2925_v11 = vpop.eup %2924 }
0x10a8   :  { %v1487_v39 = vmul.f32 %v2925_v11, %v1425_v15 }
0x110b   :  { %v1490_v12 = vpop.permute.xlu0 %1489 }
0x110c   :  { %v1492_v18 = vmul.f32 %v2925_v11, %v1490_v12 }
0x110e   :  { %1494 = vrot.lane.b32.xlu1 %v1492_v18, %s2967_s1 }
0x1180   :  { %v1495_v13 = vpop.permute.xlu1 %1494 }
0x1181   :  { %v1497_v10 = vadd.f32 %v1495_v13, %v1487_v39  ;;  %v2857_v39 = vld [vmem:[%s3282_s22] sm:$0xff]  }
0x1183   :  { %2926 = vtanh.f32 %v1497_v10 }
0x118d   :  { %v2927_v14 = vpop.eup %2926 }
0x118e   :  { %1500 = vrot.lane.b32.xlu0 %v2927_v14, %s2966_s30 }
0x1200   :  { %v1501_v16 = vpop.permute.xlu0 %1500 }
0x1201   :  { %v1503_v20 = vmul.f32 %v2925_v11, %v1501_v16 }
0x1203   :  { %v1504_v22 = vpack.c.bf16 %v1503_v20, %v1503_v20 }
0x1205   :  { %1506 = vrot.lane.b32.xlu1 %v1504_v22, %s2967_s1 }
0x1277   :  { %v1507_v19 = vpop.permute.xlu1 %1506 }
0x1278   :  { %2693 = vmatmul.mubr.msk.bf16.vlgmr.msra.gmra.mrb[36].mxu1 %vm1075_vm9, %v1507_v19 }
0x1279   :  { %2708 = vmatprep.mubr.msk.bf16.mxu1 %vm2952_vm0, %v2950_v0  ;;  %2705 = vmatpush3.bf16.msra.mxu1 %v2853_v55 }
0x127a   :  { %2706 = vmatprep.subr.bf16.mxu1 %v2950_v0 }
0x134b   :  { %v1545_v23 = vpop.f32.mrb[36].mxu1 }
0x134c   :  { %v1551_v24 = vadd.f32 %v1545_v23, %v3175_v41  ;;  %v2694_v25 = vpop.f32.mrb[37].mxu1 }
0x134d   :  { %v1548_v26 = vpop.f32.mrb[38].mxu1 }
0x134e   :  { %2928 = vtanh.f32 %v1551_v24  ;;  %v2695_v27 = vpop.f32.mrb[39].mxu1  ;;  %v2485_v30 = vmul.f32 -1.442695, %v1551_v24 }
0x1350   :  { %2930 = vpow2.f32 %v2485_v30 }
0x1358   :  { %v2929_v28 = vpop.eup %2928 }
0x1359   :  { %1561 = vrot.lane.b32.xlu0 %v2929_v28, %s2966_s30 }
0x135a   :  { %v2931_v31 = vpop.eup %2930 }
0x135b   :  { %v1555_v32 = vadd.f32 1.0, %v2931_v31 }
0x135d   :  { %2932 = vrcp.f32 %v1555_v32 }
0x1367   :  { %v2933_v33 = vpop.eup %2932 }
0x1368   :  { %v1559_v36 = vmul.f32 %v2933_v33, %v1497_v10  ;;  %v2859_v10 = vld [vmem:[%s3282_s22 + $0x8] sm:$0xff]   ;;  %s2386_s22 = sld [smem:[%s3397_s0 + %s2979_s19]]  }
0x13cb   :  { %v1562_v34 = vpop.permute.xlu0 %1561 }
0x13cc   :  { %v1564_v35 = vmul.f32 %v2933_v33, %v1562_v34 }
0x13ce   :  { %1566 = vrot.lane.b32.xlu1 %v1564_v35, %s2967_s1 }
0x1440   :  { %v1567_v40 = vpop.permute.xlu1 %1566 }
0x1441   :  { %v1569_v41 = vadd.f32 %v1567_v40, %v1559_v36  ;;  %v2498_v36 = vld [vmem:[%s2383_s13] ss:$0 sm:$0xff] }
0x1443   :  { %2934 = vtanh.f32 %v1569_v41 }
0x144d   :  { %v2935_v37 = vpop.eup %2934 }
0x144e   :  { %1572 = vrot.lane.b32.xlu0 %v2935_v37, %s2966_s30 }
0x14c0   :  { %v1573_v38 = vpop.permute.xlu0 %1572 }
0x14c1   :  { %v1575_v43 = vmul.f32 %v2933_v33, %v1573_v38 }
0x14c3   :  { %v1576_v44 = vpack.c.bf16 %v1575_v43, %v1575_v43 }
0x14c5   :  { %1578 = vrot.lane.b32.xlu1 %v1576_v44, %s2967_s1 }
0x1537   :  { %v1579_v45 = vpop.permute.xlu1 %1578 }
0x1538   :  { %2701 = vmatmul.mubr.msk.bf16.vlgmr.msra.gmra.mrb[36].mxu0 %vm1075_vm9, %v1579_v45 }
0x1539   :  { %2716 = vmatprep.mubr.msk.bf16.mxu0 %vm2952_vm0, %v2950_v0  ;;  %2713 = vmatpush3.bf16.msra.mxu0 %v2855_v3 }
0x153a   :  { %2714 = vmatprep.subr.bf16.mxu0 %v2950_v0 }
0x153d   :  { %2715 = vmatpush3.bf16.msra.mxu0 %v2856_v4 }
0x153e   :  { %2728 = vmatprep.subr.bf16.mxu0 %v2950_v0 }
0x160b   :  { %v1617_v46 = vpop.f32.mrb[36].mxu0 }
0x160c   :  { %v1623_v48 = vadd.f32 %v1617_v46, %v3177_v42  ;;  %v2702_v49 = vpop.f32.mrb[37].mxu0  ;;  %v2854_v42 = vld [vmem:[%s2375_s5 + $0x8] ss:$0 sps:$4 sm:$0xff]  }
0x160d   :  { %v1620_v50 = vpop.f32.mrb[38].mxu0  ;;  %v1674_v56 = vsel %vm155_vm1, %v2854_v42, 0  ;;  %v2864_v49 = vld [vmem:[%s2393_s9] sm:$0xff]  }
0x160e   :  { %2936 = vtanh.f32 %v1623_v48  ;;  %v2703_v21 = vpop.f32.mrb[39].mxu0  ;;  %v2487_v52 = vmul.f32 -1.442695, %v1623_v48  ;;  %2707 = vmatpush3.bf16.msra.mxu1 %v1674_v56  ;;  %v2507_v42 = vld [vmem:[%s2386_s22] ss:$0 sm:$0xff] }
0x160f   :  { %2720 = vmatprep.subr.bf16.mxu1 %v2950_v0  ;;  %v2865_v21 = vld [vmem:[%s2393_s9 + $0x8] ss:$0 sps:$4 sm:$0x33]   ;;  %s2985_s9 = smov 28  }
0x1610   :  { %2938 = vpow2.f32 %v2487_v52  ;;  %v2866_v52 = vld [vmem:[%s2394_s18] sm:$0x3f]   ;;  %s2396_s12 = sld [smem:[%s3397_s0 + %s2985_s9]]  }
0x1611   :  { %2709 = vmatmul.mubr.msk.bf16.vlgmr.msra.gmra.mrb[40].mxu1 %vm1669_vm10, %v1652_v58  ;;  %v2098_v58 = vld [vmem:[%s2395_s27] sm:$0x7] }
0x1612   :  { %2724 = vmatprep.mubr.msk.bf16.mxu1 %vm2952_vm0, %v2950_v0  ;;  %2721 = vmatpush3.bf16.msra.mxu1 %v2858_v6 }
0x1613   :  { %2722 = vmatprep.subr.bf16.mxu1 %v2950_v0 }
0x1616   :  { %2723 = vmatpush3.bf16.msra.mxu1 %v2860_v7 }
0x1617   :  { %2736 = vmatprep.subr.bf16.mxu1 %v2950_v0 }
0x1618   :  { %v2937_v51 = vpop.eup %2936 }
0x1619   :  { %1633 = vrot.lane.b32.xlu0 %v2937_v51, %s2966_s30  ;;  %v2055_v51 = vsel %vm309_vm6, %v2865_v21, 0 }
0x161a   :  { %v2939_v53 = vpop.eup %2938 }
0x161b   :  { %v1627_v54 = vadd.f32 1.0, %v2939_v53  ;;  %v2003_v53 = vsel %vm2001_vm12, %v2866_v52, 0 }
0x161d   :  { %2940 = vrcp.f32 %v1627_v54 }
0x1627   :  { %v2941_v59 = vpop.eup %2940 }
0x1628   :  { %v1631_v61 = vmul.f32 %v2941_v59, %v1569_v41 }
0x168b   :  { %v1634_v15 = vpop.permute.xlu0 %1633 }
0x168c   :  { %v1636_v60 = vmul.f32 %v2941_v59, %v1634_v15 }
0x168e   :  { %1638 = vrot.lane.b32.xlu1 %v1636_v60, %s2967_s1 }
0x16e4   :  { %v1710_v17 = vpop.f32.mrb[40].mxu1 }
0x16e5   :  { %v1711_v8 = vadd.f32 %v2488_v47, %v1710_v17  ;;  %v2710_v9 = vpop.f32.mrb[41].mxu1 }
0x16e6   :  { %v1713_v11 = vpop.f32.mrb[42].mxu1 }
0x16e7   :  { %v2711_v12 = vpop.f32.mrb[43].mxu1 }
0x1700   :  { %v1639_v62 = vpop.permute.xlu1 %1638 }
0x1701   :  { %v1641_v63 = vadd.f32 %v1639_v62, %v1631_v61 }
0x1703   :  { %2942 = vtanh.f32 %v1641_v63 }
0x1704   :  { %2944 = vtanh.f32 %v1711_v8 }
0x170d   :  { %v2943_v2 = vpop.eup %2942 }
0x170e   :  { %1644 = vrot.lane.b32.xlu0 %v2943_v2, %s2966_s30  ;;  %v2945_v18 = vpop.eup %2944  ;;  %v2097_v2 = vld [vmem:[%s2372_s2] sm:$0x3] }
0x170f   :  { %v1726_v13 = vpack.c.bf16 %v2945_v18, %v2945_v18  ;;  %v2099_v6 = vpack.c.bf16 %v2097_v2, %v2097_v2 }
0x1711   :  { %2717 = vmatmul.mubr.msk.bf16.vlgmr.msra.gmra.mrb[40].mxu0 %vm1075_vm9, %v1726_v13 }
0x1712   :  { %2354 = vrot.lane.b32.xlu0 %v348_v5, %s2957_s26  ;;  %2729 = vmatpush3.bf16.msra.mxu0 %v2857_v39  ;;  %s2975_s26 = smov 16  }
0x1713   :  { %2732 = vmatprep.mubr.msk.bf16.mxu0 %vm2952_vm0, %v2950_v0  ;;  %2730 = vmatprep.subr.bf16.mxu0 %v2950_v0  ;;  %s2384_s5 = sld [smem:[%s3397_s0 + %s2975_s26]]   ;;  %s2983_s26 = smov 29  }
0x1714   :  { %s2397_s4 = sld [smem:[%s3397_s0 + %s2983_s26]]  }
0x1716   :  { %2731 = vmatpush3.bf16.msra.mxu0 %v2859_v10 }
0x1717   :  { %2746 = vmatprep.subr.bf16.mxu0 %v2950_v0 }
0x1719   :  { %2733 = vmatmul.mubr.msk.bf16.vlgmr.msra.gmra.mrb[44].mxu0 %vm1075_vm9, %v1726_v13  ;;  %v2861_v31 = vld [vmem:[%s2384_s5] sm:$0xff]   ;;  %v2862_v32 = vld [vmem:[%s2384_s5 + $0x8] sm:$0xff]   ;;  %v2863_v33 = vld [vmem:[%s2384_s5 + $0x10] ss:$0 sps:$4 sm:$0xff]   ;;  %s2984_s5 = smov 31  }
0x171a   :  { %2748 = vmatprep.mubr.msk.bf16.mxu0 %vm2952_vm0, %v2950_v0  ;;  %v1936_v34 = vsel %vm155_vm1, %v2863_v33, 0  ;;  %2747 = vmatpush3.bf16.msra.mxu0 %v2003_v53  ;;  %v2867_v7 = vld [vmem:[%s2397_s4] sm:$0xff]   ;;  %v2868_v47 = vld [vmem:[%s2397_s4 + $0x8] sm:$0xff]   ;;  %v2869_v17 = vld [vmem:[%s2397_s4 + $0x10] sm:$0xff]   ;;  %s3366_s8 = sld [smem:[%s3397_s0 + %s2984_s5]]   ;;  %vm2351_vm1 = vcmask 1024  }
0x171b   :  { %2760 = vmatprep.subr.bf16.mxu0 %v2950_v0  ;;  %v2870_v8 = vld [vmem:[%s2397_s4 + $0x18] ss:$0 sps:$4 sm:$0x11]  }
0x171c   :  { %v2200_v9 = vsel %vm240_vm3, %v2870_v8, 0  ;;  %vm2363_vm3 = vcmask 132136  }
0x1720   :  { %v2871_v11 = vld [vmem:[%s3366_s8] sm:$0xff]   ;;  %v2872_v12 = vld [vmem:[%s3366_s8 + $0x8] sm:$0xff]   ;;  %v2873_v18 = vld [vmem:[%s3366_s8 + $0x10] sm:$0xff]  }
0x1721   :  { %v2874_v39 = vld [vmem:[%s3366_s8 + $0x18] sm:$0xff]   ;;  %v2875_v13 = vld [vmem:[%s3366_s8 + $0x20] sm:$0xff]   ;;  %v2877_v33 = vld [vmem:[%s3366_s8 + $0x30] ss:$0 sps:$4 sm:$0x33]  }
0x1780   :  { %v1645_v14 = vpop.permute.xlu0 %1644 }
0x1781   :  { %v1647_v16 = vmul.f32 %v2941_v59, %v1645_v14 }
0x1783   :  { %v1721_v20 = vpack.c.bf16 %v1647_v16, %v1647_v16 }
0x1784   :  { %v2355_v21 = vpop.permute.xlu0 %2354 }
0x1785   :  { %1783 = vrot.lane.b32.xlu1 %v1721_v20, %s2967_s1 }
0x17e4   :  { %v1776_v19 = vpop.f32.mrb[40].mxu0 }
0x17e5   :  { %v2718_v23 = vpop.f32.mrb[41].mxu0 }
0x17e6   :  { %v1779_v24 = vpop.f32.mrb[42].mxu0  ;;  %v2514_v23 = vld [vmem:[%s2396_s12] ss:$0 sm:$0xff] }
0x17e7   :  { %v2719_v25 = vpop.f32.mrb[43].mxu0 }
0x17ec   :  { %v3311_v26 = vpop.f32.mrb[44].mxu0 }
0x17ed   :  { %v2734_v27 = vpop.f32.mrb[45].mxu0 }
0x17ee   :  { %v1913_v28 = vpop.f32.mrb[46].mxu0 }
0x17ef   :  { %v2735_v30 = vpop.f32.mrb[47].mxu0 }
0x17f7   :  { %v1784_v22 = vpop.permute.xlu1 %1783 }
0x17f8   :  { %2725 = vmatmul.mubr.msk.bf16.vlgmr.msra.gmra.mrb[44].mxu1 %vm1075_vm9, %v1784_v22 }
0x17f9   :  { %2742 = vmatprep.mubr.msk.bf16.mxu1 %vm2952_vm0, %v2950_v0  ;;  %2737 = vmatpush3.bf16.msra.mxu1 %v2861_v31 }
0x17fa   :  { %2738 = vmatprep.subr.bf16.mxu1 %v2950_v0 }
0x17fd   :  { %2739 = vmatpush3.bf16.msra.mxu1 %v2862_v32  ;;  %v2876_v32 = vld [vmem:[%s3366_s8 + $0x28] sm:$0xff]  }
0x17fe   :  { %2740 = vmatprep.subr.bf16.mxu1 %v2950_v0 }
0x1801   :  { %2741 = vmatpush3.bf16.msra.mxu1 %v1936_v34  ;;  %v2308_v34 = vsel %vm309_vm6, %v2877_v33, 0 }
0x1802   :  { %2752 = vmatprep.subr.bf16.mxu1 %v2950_v0 }
0x18cb   :  { %v1834_v35 = vpop.f32.mrb[44].mxu1 }
0x18cc   :  { %v1835_v40 = vadd.f32 %v1834_v35, %v1776_v19  ;;  %v2726_v41 = vpop.f32.mrb[45].mxu1  ;;  %v72_v35 = vstv %s2400_s16 }
0x18cd   :  { %v1837_v37 = vpop.f32.mrb[46].mxu1  ;;  %73 = vst [vmem:[#allocation2] sm:$0x1] %v72_v35 }
0x18ce   :  { %v1847_v38 = vadd.f32 %v2498_v36, %v1835_v40  ;;  %v2727_v43 = vpop.f32.mrb[47].mxu1  ;;  %v2515_v36 = vld [vmem:[%s2398_s24] ss:$0 sm:$0xff] }
0x18d0   :  { %v2499_v44 = vmul.f32 -1.442695, %v1847_v38 }
0x18d2   :  { %2946 = vpow2.f32 %v2499_v44 }
0x18dc   :  { %v2947_v45 = vpop.eup %2946 }
0x18dd   :  { %v1851_v46 = vadd.f32 1.0, %v2947_v45 }
0x18df   :  { %2948 = vrcp.f32 %v1851_v46  ;;  %v2521_v46 = vld [vmem:[#allocation2] ss:$0 sm:$0xff] }
0x18e9   :  { %v2949_v48 = vpop.eup %2948 }
0x18ea   :  { %v1859_v50 = vpack.c.bf16 %v2949_v48, %v2949_v48 }
0x18ec   :  { %2743 = vmatmul.mubr.msk.bf16.vlgmr.msra.gmra.mrb[48].mxu1 %vm1931_vm11, %v1859_v50 }
0x18ed   :  { %2753 = vmatpush3.bf16.msra.mxu1 %v2864_v49  ;;  %2756 = vmatprep.mubr.msk.bf16.mxu1 %vm2952_vm0, %v2950_v0 }
0x18ee   :  { %2754 = vmatprep.subr.bf16.mxu1 %v2950_v0 }
0x18f1   :  { %2755 = vmatpush3.bf16.msra.mxu1 %v2055_v51 }
0x18f2   :  { %2766 = vmatprep.subr.bf16.mxu1 %v2950_v0 }
0x18f4   :  { %2757 = vmatmul.mubr.msk.bf16.vlgmr.msra.gmra.mrb[52].mxu1 %vm305_vm8, %v3119_v29  ;;  %v2981_v29 = vmov 65535  }
0x18f5   :  { %2774 = vmatprep.mubr.msk.bf16.mxu1 %vm2952_vm0, %v2950_v0  ;;  %v2105_v54 = vsel %vm309_vm6, 4294967295, %v2981_v29  ;;  %2767 = vmatpush3.bf16.msra.mxu1 %v2867_v7 }
0x18f6   :  { %v2106_v59 = vsel %vm2104_vm13, %v2105_v54, 0  ;;  %2768 = vmatprep.subr.bf16.mxu1 %v2950_v0 }
0x18f7   :  { %v2108_v62 = vand.u32 %v2106_v59, %v2098_v58 }
0x18f9   :  { %2769 = vmatpush3.bf16.msra.mxu1 %v2868_v47 }
0x18fa   :  { %2770 = vmatprep.subr.bf16.mxu1 %v2950_v0 }
0x18fd   :  { %2771 = vmatpush3.bf16.msra.mxu1 %v2869_v17 }
0x18fe   :  { %2772 = vmatprep.subr.bf16.mxu1 %v2950_v0 }
0x1901   :  { %2773 = vmatpush3.bf16.msra.mxu1 %v2200_v9 }
0x19bf   :  { %v1972_v55 = vpop.f32.mrb[48].mxu1 }
0x19c0   :  { %v1973_v56 = vadd.f32 %v1972_v55, %v3311_v26  ;;  %v2744_v57 = vpop.f32.mrb[49].mxu1 }
0x19c1   :  { %v1975_v15 = vpop.f32.mrb[50].mxu1 }
0x19c2   :  { %v1985_v60 = vadd.f32 %v2507_v42, %v1973_v56  ;;  %v2745_v61 = vpop.f32.mrb[51].mxu1 }
0x19c4   :  { %v1991_v63 = vpack.c.bf16 %v1985_v60, %v1985_v60  ;;  %2360 = vrot.lane.b32.xlu1 %v1985_v60, %s2955_s15 }
0x19c6   :  { %2749 = vmatmul.mubr.msk.bf16.vlgmr.msra.gmra.mrb[48].mxu0 %vm1997_vm14, %v1991_v63 }
0x19c7   :  { %v2091_v1 = vpop.f32.mrb[52].mxu1  ;;  %2761 = vmatpush3.bf16.msra.mxu0 %v2108_v62  ;;  %2762 = vmatprep.mubr.msk.bf16.mxu0 %vm2952_vm0, %v2950_v0 }
0x19c8   :  { %v2758_v3 = vpop.f32.mrb[53].mxu1  ;;  %2778 = vmatprep.subr.bf16.mxu0 %v2950_v0 }
0x19c9   :  { %v2094_v4 = vpop.f32.mrb[54].mxu1 }
0x19ca   :  { %v2759_v5 = vpop.f32.mrb[55].mxu1 }
0x19ce   :  { %2763 = vmatmul.mubr.msk.bf16.vlgmr.msra.gmra.mrb[52].mxu0 %vm2100_vm15, %v2099_v6 }
0x19cf   :  { %2792 = vmatprep.mubr.msk.bf16.mxu0 %vm2952_vm0, %v2950_v0  ;;  %2779 = vmatpush3.bf16.msra.mxu0 %v2871_v11  ;;  %vm2303_vm0 = vcmask 818176  }
0x19d0   :  { %2780 = vmatprep.subr.bf16.mxu0 %v2950_v0 }
0x19d3   :  { %2781 = vmatpush3.bf16.msra.mxu0 %v2872_v12 }
0x19d4   :  { %2782 = vmatprep.subr.bf16.mxu0 %v2950_v0 }
0x19d7   :  { %2783 = vmatpush3.bf16.msra.mxu0 %v2873_v18 }
0x19d8   :  { %2784 = vmatprep.subr.bf16.mxu0 %v2950_v0 }
0x19db   :  { %2785 = vmatpush3.bf16.msra.mxu0 %v2874_v39 }
0x19dc   :  { %2786 = vmatprep.subr.bf16.mxu0 %v2950_v0 }
0x19df   :  { %2787 = vmatpush3.bf16.msra.mxu0 %v2875_v13 }
0x19e0   :  { %2788 = vmatprep.subr.bf16.mxu0 %v2950_v0 }
0x19e3   :  { %2789 = vmatpush3.bf16.msra.mxu0 %v2876_v32 }
0x19e4   :  { %2790 = vmatprep.subr.bf16.mxu0 %v2950_v0 }
0x19e7   :  { %2791 = vmatpush3.bf16.msra.mxu0 %v2308_v34 }
0x1a36   :  { %v2361_v52 = vpop.permute.xlu1 %2360 }
0x1a99   :  { %v2039_v10 = vpop.f32.mrb[48].mxu0 }
0x1a9a   :  { %v2092_v14 = vadd.f32 %v2091_v1, %v2039_v10  ;;  %v2750_v16 = vpop.f32.mrb[49].mxu0 }
0x1a9b   :  { %v2042_v20 = vpop.f32.mrb[50].mxu0 }
0x1a9c   :  { %v2751_v22 = vpop.f32.mrb[51].mxu0 }
0x1aa1   :  { %v2144_v19 = vpop.f32.mrb[52].mxu0 }
0x1aa2   :  { %v2150_v24 = vadd.f32 %v2144_v19, %v2092_v14  ;;  %v2764_v25 = vpop.f32.mrb[53].mxu0 }
0x1aa3   :  { %v2147_v26 = vpop.f32.mrb[54].mxu0 }
0x1aa4   :  { %v2158_v27 = vadd.f32 %v2514_v23, %v2150_v24  ;;  %v2765_v28 = vpop.f32.mrb[55].mxu0 }
0x1aa6   :  { %v2159_v30 = vmax.f32 %v2158_v27, 0.0 }
0x1aa8   :  { %v2167_v31 = vpack.c.bf16 %v2159_v30, %v2159_v30 }
0x1aaa   :  { %2775 = vmatmul.mubr.msk.bf16.vlgmr.msra.gmra.mrb[56].mxu1 %vm236_vm5, %v2167_v31 }
0x1b7d   :  { %v2236_v40 = vpop.f32.mrb[56].mxu1 }
0x1b7e   :  { %v2237_v41 = vadd.f32 %v2515_v36, %v2236_v40  ;;  %v2776_v37 = vpop.f32.mrb[57].mxu1 }
0x1b7f   :  { %v2239_v38 = vpop.f32.mrb[58].mxu1 }
0x1b80   :  { %v2242_v43 = vmax.f32 %v2237_v41, 0.0  ;;  %v2777_v44 = vpop.f32.mrb[59].mxu1 }
0x1b82   :  { %v2256_v45 = vpack.c.bf16 %v2242_v43, %v2242_v43 }
0x1b84   :  { %2793 = vmatmul.mubr.msk.bf16.vlgmr.msra.gmra.mrb[56].mxu0 %vm2303_vm0, %v2256_v45 }
0x1c57   :  { %v2344_v48 = vpop.f32.mrb[56].mxu0 }
0x1c58   :  { %v2345_v49 = vadd.f32 %v2521_v46, %v2344_v48  ;;  %v2794_v0 = vpop.f32.mrb[57].mxu0 }
0x1c59   :  { %v2347_v50 = vpop.f32.mrb[58].mxu0 }
0x1c5a   :  { %2352 = vst.msk [vmem:[%s2401_s20] sm:$0x3] %vm2351_vm1, %v2345_v49  ;;  %v2795_v51 = vpop.f32.mrb[59].mxu0 }
0x1c5b   :  { %2358 = vst.msk [vmem:[%s2401_s20] sm:$0x3] %vm2357_vm2, %v2355_v21 }
0x1c5c   :  { %2364 = vst.msk [vmem:[%s2401_s20] sm:$0x3] %vm2363_vm3, %v2361_v52 }

</bundles_post_ra>
